<compile_context>
chip_gen: v6e
topology: v6e:2x2x1
jax: 0.10.0
libtpu: 0.0.40
codegen_flags: <defaults>
</compile_context>

<pallas_src>
import functools

import jax
import jax.numpy as jnp
from jax import lax
from jax.experimental import pallas as pl
from jax.experimental.pallas import tpu as pltpu


def _layernorm(x, gamma, beta, eps=1e-5):
    mu = jnp.mean(x, axis=-1, keepdims=True)
    var = jnp.mean((x - mu) ** 2, axis=-1, keepdims=True)
    return (x - mu) * lax.rsqrt(var + eps) * gamma + beta


def _encoder_layer_kernel(h, d_k, d_v,
                          x_ref, mpad_ref, kmask_ref,
                          wqkv_ref, bqkv_ref, wo_ref, bo_ref,
                          g_mha_ref, be_mha_ref, g1_ref, be1_ref,
                          w1_ref, b1_ref, w2_ref, b2_ref,
                          gf_ref, bef_ref,
                          o_ref):
    bt, s, d = x_ref.shape
    hk = h * d_k
    hv = h * d_v
    m = bt * s

    x = x_ref[...]                               # (Bt, S, D) f32
    xm = x.reshape(m, d)                         # flatten batch into matmul M dim
    x_bf = xm.astype(jnp.bfloat16)

    # ---- fused Q/K/V projection (one MXU pass, N = 2*HK + HV) ----------------
    qkv = jnp.dot(x_bf, wqkv_ref[...],
                  preferred_element_type=jnp.float32) + bqkv_ref[...]
    scale = 1.0 / (d_k ** 0.5)
    q = (qkv[:, :hk] * scale).astype(jnp.bfloat16).reshape(bt, s, hk)
    k = qkv[:, hk:2 * hk].astype(jnp.bfloat16).reshape(bt, s, hk)
    v = qkv[:, 2 * hk:].astype(jnp.bfloat16).reshape(bt, s, hv)

    # Additive key mask, computed once per block (NaN-safe for fully masked rows).
    neg = jnp.where(kmask_ref[...] > 0.0, -1e30, 0.0)        # (Bt, 1, S) f32

    wo = wo_ref[...]                                          # (HV, D) bf16
    mha = jnp.zeros((m, d), jnp.float32)
    for hh in range(h):                                       # static head loop
        qh = q[:, :, hh * d_k:(hh + 1) * d_k]                 # (Bt, S, dk)
        kh = k[:, :, hh * d_k:(hh + 1) * d_k]
        vh = v[:, :, hh * d_v:(hh + 1) * d_v]
        scores = jnp.einsum('bqd,bkd->bqk', qh, kh,
                            preferred_element_type=jnp.float32)   # (Bt, S, S)
        scores = scores + neg
        row_max = jnp.max(scores, axis=-1, keepdims=True)
        e = jnp.exp(scores - row_max)
        p = e * pl.reciprocal(jnp.sum(e, axis=-1, keepdims=True), approx=True)
        ctx = jnp.einsum('bqk,bkd->bqd', p.astype(jnp.bfloat16), vh,
                         preferred_element_type=jnp.float32)      # (Bt, S, dv)
        # Accumulate directly through the output projection (no lane concat).
        mha = mha + jnp.dot(ctx.reshape(m, d_v).astype(jnp.bfloat16),
                            wo[hh * d_v:(hh + 1) * d_v, :],
                            preferred_element_type=jnp.float32)
    mha = mha + bo_ref[...]

    # MultiHeadAttention internal residual + layer_norm (dropout == identity).
    mha = _layernorm(xm + mha, g_mha_ref[...], be_mha_ref[...])
    # EncoderLayer: lnorm1(input + dropout1(self_att)); then * mask_pad.
    y = _layernorm(xm + mha, g1_ref[...], be1_ref[...])
    mpad = mpad_ref[...].reshape(m, 1)
    y = y * mpad

    # ---- PositionWiseFeedForward --------------------------------------------
    h1 = jnp.maximum(
        jnp.dot(y.astype(jnp.bfloat16), w1_ref[...],
                preferred_element_type=jnp.float32) + b1_ref[...], 0.0)
    ff = jnp.dot(h1.astype(jnp.bfloat16), w2_ref[...],
                 preferred_element_type=jnp.float32) + b2_ref[...]
    ff = _layernorm(y + ff, gf_ref[...], bef_ref[...])

    o_ref[...] = (ff * mpad).reshape(bt, s, d).astype(o_ref.dtype)


def _pick_batch_block(B, S, D, d_ff, qkv_width):
    """Largest batch block s.t. (a) >=2 parallel grid steps remain when B >= 2
    (v7x has 2 TensorCores), (b) a conservative VMEM estimate stays small, and
    (c) growth stops once the matmul M dimension reaches ~256 (v6e/v7x MXU)."""
    best = 1
    for bt in range(1, B + 1):
        if B % bt != 0:
            continue
        if B >= 2 and B // bt < 2:
            break
        rows = bt * S
        est_bytes = 4 * rows * (4 * D + d_ff + qkv_width) + 8 * bt * S * S
        if est_bytes > 24 * 1024 * 1024:
            break
        best = bt
        if rows >= 256:
            break
    return best


def encoder_layer(x, mask_pad, key_mask, params, *, h, d_k, d_v):
    """x: (B,S,D) f32; mask_pad: (B,S,1) f32 multiplicative; key_mask: (B,1,S)
    f32 with 1.0 == masked key position."""
    B, S, D = x.shape
    HK, HV = h * d_k, h * d_v
    DFF = params["w1"].shape[1]

    # Host-side fusion / bf16 cast of matmul weights (biases + LN params stay f32).
    wqkv = jnp.concatenate(
        [params["wq"], params["wk"], params["wv"]], axis=1).astype(jnp.bfloat16)
    bqkv = jnp.concatenate([params["bq"], params["bk"], params["bv"]], axis=1)
    wo = params["wo"].astype(jnp.bfloat16)
    w1 = params["w1"].astype(jnp.bfloat16)
    w2 = params["w2"].astype(jnp.bfloat16)

    Bt = _pick_batch_block(B, S, D, DFF, 2 * HK + HV)
    grid = (B // Bt,)

    def const_spec(a):
        nd = a.ndim
        return pl.BlockSpec(a.shape, lambda b, _nd=nd: (0,) * _nd)

    in_specs = [
        pl.BlockSpec((Bt, S, D), lambda b: (b, 0, 0)),   # x
        pl.BlockSpec((Bt, S, 1), lambda b: (b, 0, 0)),   # mask_pad
        pl.BlockSpec((Bt, 1, S), lambda b: (b, 0, 0)),   # key mask (compact)
        const_spec(wqkv), const_spec(bqkv),
        const_spec(wo), const_spec(params["bo"]),
        const_spec(params["g_mha"]), const_spec(params["b_mha"]),
        const_spec(params["g_ln1"]), const_spec(params["b_ln1"]),
        const_spec(w1), const_spec(params["b1"]),
        const_spec(w2), const_spec(params["b2"]),
        const_spec(params["g_ff"]), const_spec(params["b_ff"]),
    ]

    kernel = functools.partial(_encoder_layer_kernel, h, d_k, d_v)
    return pl.pallas_call(
        kernel,
        out_shape=jax.ShapeDtypeStruct((B, S, D), x.dtype),
        grid=grid,
        in_specs=in_specs,
        out_specs=pl.BlockSpec((Bt, S, D), lambda b: (b, 0, 0)),
        compiler_params=pltpu.CompilerParams(
            dimension_semantics=("parallel",),
            vmem_limit_bytes=64 * 1024 * 1024),
    )(x, mask_pad, key_mask, wqkv, bqkv, wo, params["bo"],
      params["g_mha"], params["b_mha"], params["g_ln1"], params["b_ln1"],
      w1, params["b1"], w2, params["b2"], params["g_ff"], params["b_ff"])


def reference(x, mask_pad, key_mask, p, h, d_k, d_v):
    """Pure-JAX f32 reference matching the PyTorch forward (eval mode)."""
    B, S, D = x.shape

    def ln(z, g, b, eps=1e-5):
        mu = z.mean(-1, keepdims=True)
        var = ((z - mu) ** 2).mean(-1, keepdims=True)
        return (z - mu) / jnp.sqrt(var + eps) * g + b

    q = (x @ p["wq"] + p["bq"]).reshape(B, S, h, d_k).transpose(0, 2, 1, 3)
    k = (x @ p["wk"] + p["bk"]).reshape(B, S, h, d_k).transpose(0, 2, 1, 3)
    v = (x @ p["wv"] + p["bv"]).reshape(B, S, h, d_v).transpose(0, 2, 1, 3)
    att = jnp.einsum("bhqd,bhkd->bhqk", q, k) / jnp.sqrt(d_k)
    att = jnp.where(key_mask[:, None, :, :] > 0, -1e30, att)
    att = jax.nn.softmax(att, -1)
    o = jnp.einsum("bhqk,bhkd->bhqd", att, v).transpose(0, 2, 1, 3).reshape(B, S, h * d_v)
    mha = o @ p["wo"] + p["bo"]
    mha = ln(x + mha, p["g_mha"], p["b_mha"])
    y = ln(x + mha, p["g_ln1"], p["b_ln1"]) * mask_pad
    ff = jnp.maximum(y @ p["w1"] + p["b1"], 0.0) @ p["w2"] + p["b2"]
    ff = ln(y + ff, p["g_ff"], p["b_ff"]) * mask_pad
    return ff


if __name__ == "__main__":
    # Small, TPU-friendly shapes consistent with the module's forward.
    B, S, D = 2, 16, 128
    H, D_K, D_V, D_FF = 4, 32, 32, 256
    HK, HV = H * D_K, H * D_V

    key = jax.random.PRNGKey(0)
    ks = jax.random.split(key, 12)

    def init(k, shape, scale=0.02):
        return scale * jax.random.normal(k, shape, jnp.float32)

    params = {
        "wq": init(ks[0], (D, HK)), "bq": init(ks[1], (1, HK)),
        "wk": init(ks[2], (D, HK)), "bk": init(ks[3], (1, HK)),
        "wv": init(ks[4], (D, HV)), "bv": init(ks[5], (1, HV)),
        "wo": init(ks[6], (HV, D)), "bo": init(ks[7], (1, D)),
        "g_mha": jnp.ones((1, D), jnp.float32), "b_mha": jnp.zeros((1, D), jnp.float32),
        "g_ln1": jnp.ones((1, D), jnp.float32), "b_ln1": jnp.zeros((1, D), jnp.float32),
        "w1": init(ks[8], (D, D_FF)), "b1": init(ks[9], (1, D_FF)),
        "w2": init(ks[10], (D_FF, D)), "b2": init(ks[11], (1, D)),
        "g_ff": jnp.ones((1, D), jnp.float32), "b_ff": jnp.zeros((1, D), jnp.float32),
    }

    x = jax.random.normal(jax.random.PRNGKey(42), (B, S, D), jnp.float32)

    # Padding masks: per-batch valid lengths (no row fully masked).
    valid = jnp.array([13, 9], jnp.int32)
    pos = jnp.arange(S)
    mask_pad = (pos[None, :] < valid[:, None]).astype(jnp.float32)[:, :, None]   # (B,S,1)
    key_mask = (pos[None, :] >= valid[:, None]).astype(jnp.float32)[:, None, :]  # (B,1,S)

    out = encoder_layer(x, mask_pad, key_mask, params, h=H, d_k=D_K, d_v=D_V)
    out = jax.block_until_ready(out)

    ref = reference(x, mask_pad, key_mask, params, H, D_K, D_V)
    err = float(jnp.max(jnp.abs(out - ref)))
    # bf16 MXU operands + approximate softmax reciprocal vs. an f32 reference.
    assert err < 2e-2, f"max abs error too large: {err}"

    print("KERNEL_OK")
</pallas_src>

<mosaic_0001>
module attributes {stable_mosaic.version = 11 : i64} {
  func.func @_encoder_layer_kernel(%arg0: i32, %arg1: memref<1x16x128xf32, #tpu.memory_space<vmem>>, %arg2: memref<1x16x1xf32, #tpu.memory_space<vmem>>, %arg3: memref<1x1x16xf32, #tpu.memory_space<vmem>>, %arg4: memref<128x384xbf16, #tpu.memory_space<vmem>>, %arg5: memref<1x384xf32, #tpu.memory_space<vmem>>, %arg6: memref<128x128xbf16, #tpu.memory_space<vmem>>, %arg7: memref<1x128xf32, #tpu.memory_space<vmem>>, %arg8: memref<1x128xf32, #tpu.memory_space<vmem>>, %arg9: memref<1x128xf32, #tpu.memory_space<vmem>>, %arg10: memref<1x128xf32, #tpu.memory_space<vmem>>, %arg11: memref<1x128xf32, #tpu.memory_space<vmem>>, %arg12: memref<128x256xbf16, #tpu.memory_space<vmem>>, %arg13: memref<1x256xf32, #tpu.memory_space<vmem>>, %arg14: memref<256x128xbf16, #tpu.memory_space<vmem>>, %arg15: memref<1x128xf32, #tpu.memory_space<vmem>>, %arg16: memref<1x128xf32, #tpu.memory_space<vmem>>, %arg17: memref<1x128xf32, #tpu.memory_space<vmem>>, %arg18: memref<1x16x128xf32, #tpu.memory_space<vmem>>) attributes {dimension_semantics = [#tpu.dimension_semantics<parallel>], iteration_bounds = array<i64: 2>, scalar_prefetch = 0 : i64, scratch_operands = 0 : i64, tpu.core_type = #tpu.core_type<tc>, window_params = [{transform_indices = @transform_0, window_bounds = array<i64: 1, 16, 128>}, {transform_indices = @transform_1, window_bounds = array<i64: 1, 16, 1>}, {transform_indices = @transform_2, window_bounds = array<i64: 1, 1, 16>}, {pipeline_mode = #tpu.pipeline_mode<synchronous>, transform_indices = @transform_3, window_bounds = array<i64: 128, 384>}, {pipeline_mode = #tpu.pipeline_mode<synchronous>, transform_indices = @transform_4, window_bounds = array<i64: 1, 384>}, {pipeline_mode = #tpu.pipeline_mode<synchronous>, transform_indices = @transform_5, window_bounds = array<i64: 128, 128>}, {pipeline_mode = #tpu.pipeline_mode<synchronous>, transform_indices = @transform_6, window_bounds = array<i64: 1, 128>}, {pipeline_mode = #tpu.pipeline_mode<synchronous>, transform_indices = @transform_7, window_bounds = array<i64: 1, 128>}, {pipeline_mode = #tpu.pipeline_mode<synchronous>, transform_indices = @transform_8, window_bounds = array<i64: 1, 128>}, {pipeline_mode = #tpu.pipeline_mode<synchronous>, transform_indices = @transform_9, window_bounds = array<i64: 1, 128>}, {pipeline_mode = #tpu.pipeline_mode<synchronous>, transform_indices = @transform_10, window_bounds = array<i64: 1, 128>}, {pipeline_mode = #tpu.pipeline_mode<synchronous>, transform_indices = @transform_11, window_bounds = array<i64: 128, 256>}, {pipeline_mode = #tpu.pipeline_mode<synchronous>, transform_indices = @transform_12, window_bounds = array<i64: 1, 256>}, {pipeline_mode = #tpu.pipeline_mode<synchronous>, transform_indices = @transform_13, window_bounds = array<i64: 256, 128>}, {pipeline_mode = #tpu.pipeline_mode<synchronous>, transform_indices = @transform_14, window_bounds = array<i64: 1, 128>}, {pipeline_mode = #tpu.pipeline_mode<synchronous>, transform_indices = @transform_15, window_bounds = array<i64: 1, 128>}, {pipeline_mode = #tpu.pipeline_mode<synchronous>, transform_indices = @transform_16, window_bounds = array<i64: 1, 128>}, {transform_indices = @transform_17, window_bounds = array<i64: 1, 16, 128>}]} {
    %c0 = arith.constant 0 : index
    %c0_0 = arith.constant 0 : index
    %c0_1 = arith.constant 0 : index
    %0 = vector.load %arg1[%c0, %c0_0, %c0_1] : memref<1x16x128xf32, #tpu.memory_space<vmem>>, vector<1x16x128xf32>
    %1 = vector.shape_cast %0 : vector<1x16x128xf32> to vector<16x128xf32>
    %2 = arith.truncf %1 : vector<16x128xf32> to vector<16x128xbf16>
    %c0_2 = arith.constant 0 : index
    %c0_3 = arith.constant 0 : index
    %3 = vector.load %arg4[%c0_2, %c0_3] : memref<128x384xbf16, #tpu.memory_space<vmem>>, vector<128x384xbf16>
    %cst = arith.constant dense<0.000000e+00> : vector<16x384xf32>
    %4 = tpu.matmul %2, %3, %cst {dimension_numbers = #tpu.dot_dimension_numbers<[1], [0], [0], [1], [0, 0, 1, 1], [], []>} : vector<16x128xbf16>, vector<128x384xbf16>, vector<16x384xf32> -> vector<16x384xf32>
    %c0_4 = arith.constant 0 : index
    %c0_5 = arith.constant 0 : index
    %5 = vector.load %arg5[%c0_4, %c0_5] : memref<1x384xf32, #tpu.memory_space<vmem>>, vector<1x384xf32>
    %6 = vector.broadcast %5 : vector<1x384xf32> to vector<16x384xf32>
    %7 = arith.addf %4, %6 : vector<16x384xf32>
    %8 = vector.extract_strided_slice %7 {offsets = [0, 0], sizes = [16, 128], strides = [1, 1]} : vector<16x384xf32> to vector<16x128xf32>
    %cst_6 = arith.constant 0.176776692 : f32
    %9 = vector.broadcast %cst_6 : f32 to vector<16x128xf32>
    %10 = arith.mulf %8, %9 : vector<16x128xf32>
    %11 = arith.truncf %10 : vector<16x128xf32> to vector<16x128xbf16>
    %12 = vector.shape_cast %11 : vector<16x128xbf16> to vector<1x16x128xbf16>
    %13 = vector.extract_strided_slice %7 {offsets = [0, 128], sizes = [16, 128], strides = [1, 1]} : vector<16x384xf32> to vector<16x128xf32>
    %14 = arith.truncf %13 : vector<16x128xf32> to vector<16x128xbf16>
    %15 = vector.shape_cast %14 : vector<16x128xbf16> to vector<1x16x128xbf16>
    %16 = vector.extract_strided_slice %7 {offsets = [0, 256], sizes = [16, 128], strides = [1, 1]} : vector<16x384xf32> to vector<16x128xf32>
    %17 = arith.truncf %16 : vector<16x128xf32> to vector<16x128xbf16>
    %18 = vector.shape_cast %17 : vector<16x128xbf16> to vector<1x16x128xbf16>
    %c0_7 = arith.constant 0 : index
    %c0_8 = arith.constant 0 : index
    %c0_9 = arith.constant 0 : index
    %19 = vector.load %arg3[%c0_7, %c0_8, %c0_9] : memref<1x1x16xf32, #tpu.memory_space<vmem>>, vector<1x1x16xf32>
    %cst_10 = arith.constant 0.000000e+00 : f32
    %20 = vector.broadcast %cst_10 : f32 to vector<1x1x16xf32>
    %21 = arith.cmpf ogt, %19, %20 : vector<1x1x16xf32>
    %cst_11 = arith.constant -1.000000e+30 : f32
    %cst_12 = arith.constant 0.000000e+00 : f32
    %22 = vector.broadcast %cst_11 : f32 to vector<1x1x16xf32>
    %23 = vector.broadcast %cst_12 : f32 to vector<1x1x16xf32>
    %24 = arith.select %21, %22, %23 : vector<1x1x16xi1>, vector<1x1x16xf32>
    %c0_13 = arith.constant 0 : index
    %c0_14 = arith.constant 0 : index
    %25 = vector.load %arg6[%c0_13, %c0_14] : memref<128x128xbf16, #tpu.memory_space<vmem>>, vector<128x128xbf16>
    %cst_15 = arith.constant 0.000000e+00 : f32
    %26 = vector.broadcast %cst_15 : f32 to vector<16x128xf32>
    %27 = vector.extract_strided_slice %12 {offsets = [0, 0, 0], sizes = [1, 16, 32], strides = [1, 1, 1]} : vector<1x16x128xbf16> to vector<1x16x32xbf16>
    %28 = vector.extract_strided_slice %15 {offsets = [0, 0, 0], sizes = [1, 16, 32], strides = [1, 1, 1]} : vector<1x16x128xbf16> to vector<1x16x32xbf16>
    %29 = vector.extract_strided_slice %18 {offsets = [0, 0, 0], sizes = [1, 16, 32], strides = [1, 1, 1]} : vector<1x16x128xbf16> to vector<1x16x32xbf16>
    "tpu.trace_start"() <{level = 10 : i32, message = "bqd,bkd->bqk"}> : () -> ()
    %cst_16 = arith.constant dense<0.000000e+00> : vector<1x16x16xf32>
    %30 = tpu.matmul %27, %28, %cst_16 {dimension_numbers = #tpu.dot_dimension_numbers<[2], [2], [1], [1], [0, 0, 0, 1, 1, 1], [0], [0]>} : vector<1x16x32xbf16>, vector<1x16x32xbf16>, vector<1x16x16xf32> -> vector<1x16x16xf32>
    "tpu.trace_stop"() : () -> ()
    %31 = vector.broadcast %24 : vector<1x1x16xf32> to vector<1x16x16xf32>
    %32 = arith.addf %30, %31 : vector<1x16x16xf32>
    %cst_17 = arith.constant dense<0xFF800000> : vector<1x16xf32>
    %33 = vector.multi_reduction <maximumf>, %32, %cst_17 [2] : vector<1x16x16xf32> to vector<1x16xf32>
    %34 = vector.shape_cast %33 : vector<1x16xf32> to vector<1x16x1xf32>
    %35 = vector.broadcast %34 : vector<1x16x1xf32> to vector<1x16x16xf32>
    %36 = arith.subf %32, %35 : vector<1x16x16xf32>
    %37 = math.exp %36 : vector<1x16x16xf32>
    %cst_18 = arith.constant dense<0.000000e+00> : vector<1x16xf32>
    %38 = vector.multi_reduction <add>, %37, %cst_18 [2] : vector<1x16x16xf32> to vector<1x16xf32>
    %39 = vector.shape_cast %38 : vector<1x16xf32> to vector<1x16x1xf32>
    %40 = tpu.reciprocal %39 {approx = true} : vector<1x16x1xf32> -> vector<1x16x1xf32>
    %41 = vector.broadcast %40 : vector<1x16x1xf32> to vector<1x16x16xf32>
    %42 = arith.mulf %37, %41 : vector<1x16x16xf32>
    %43 = arith.truncf %42 : vector<1x16x16xf32> to vector<1x16x16xbf16>
    "tpu.trace_start"() <{level = 10 : i32, message = "bqk,bkd->bqd"}> : () -> ()
    %cst_19 = arith.constant dense<0.000000e+00> : vector<1x16x32xf32>
    %44 = tpu.matmul %43, %29, %cst_19 {dimension_numbers = #tpu.dot_dimension_numbers<[2], [1], [1], [2], [0, 0, 0, 1, 1, 2], [0], [0]>} : vector<1x16x16xbf16>, vector<1x16x32xbf16>, vector<1x16x32xf32> -> vector<1x16x32xf32>
    "tpu.trace_stop"() : () -> ()
    %45 = vector.shape_cast %44 : vector<1x16x32xf32> to vector<16x32xf32>
    %46 = arith.truncf %45 : vector<16x32xf32> to vector<16x32xbf16>
    %47 = vector.extract_strided_slice %25 {offsets = [0, 0], sizes = [32, 128], strides = [1, 1]} : vector<128x128xbf16> to vector<32x128xbf16>
    %cst_20 = arith.constant dense<0.000000e+00> : vector<16x128xf32>
    %48 = tpu.matmul %46, %47, %cst_20 {dimension_numbers = #tpu.dot_dimension_numbers<[1], [0], [0], [1], [0, 0, 1, 1], [], []>} : vector<16x32xbf16>, vector<32x128xbf16>, vector<16x128xf32> -> vector<16x128xf32>
    %49 = arith.addf %26, %48 : vector<16x128xf32>
    %50 = vector.extract_strided_slice %12 {offsets = [0, 0, 32], sizes = [1, 16, 32], strides = [1, 1, 1]} : vector<1x16x128xbf16> to vector<1x16x32xbf16>
    %51 = vector.extract_strided_slice %15 {offsets = [0, 0, 32], sizes = [1, 16, 32], strides = [1, 1, 1]} : vector<1x16x128xbf16> to vector<1x16x32xbf16>
    %52 = vector.extract_strided_slice %18 {offsets = [0, 0, 32], sizes = [1, 16, 32], strides = [1, 1, 1]} : vector<1x16x128xbf16> to vector<1x16x32xbf16>
    "tpu.trace_start"() <{level = 10 : i32, message = "bqd,bkd->bqk"}> : () -> ()
    %cst_21 = arith.constant dense<0.000000e+00> : vector<1x16x16xf32>
    %53 = tpu.matmul %50, %51, %cst_21 {dimension_numbers = #tpu.dot_dimension_numbers<[2], [2], [1], [1], [0, 0, 0, 1, 1, 1], [0], [0]>} : vector<1x16x32xbf16>, vector<1x16x32xbf16>, vector<1x16x16xf32> -> vector<1x16x16xf32>
    "tpu.trace_stop"() : () -> ()
    %54 = vector.broadcast %24 : vector<1x1x16xf32> to vector<1x16x16xf32>
    %55 = arith.addf %53, %54 : vector<1x16x16xf32>
    %cst_22 = arith.constant dense<0xFF800000> : vector<1x16xf32>
    %56 = vector.multi_reduction <maximumf>, %55, %cst_22 [2] : vector<1x16x16xf32> to vector<1x16xf32>
    %57 = vector.shape_cast %56 : vector<1x16xf32> to vector<1x16x1xf32>
    %58 = vector.broadcast %57 : vector<1x16x1xf32> to vector<1x16x16xf32>
    %59 = arith.subf %55, %58 : vector<1x16x16xf32>
    %60 = math.exp %59 : vector<1x16x16xf32>
    %cst_23 = arith.constant dense<0.000000e+00> : vector<1x16xf32>
    %61 = vector.multi_reduction <add>, %60, %cst_23 [2] : vector<1x16x16xf32> to vector<1x16xf32>
    %62 = vector.shape_cast %61 : vector<1x16xf32> to vector<1x16x1xf32>
    %63 = tpu.reciprocal %62 {approx = true} : vector<1x16x1xf32> -> vector<1x16x1xf32>
    %64 = vector.broadcast %63 : vector<1x16x1xf32> to vector<1x16x16xf32>
    %65 = arith.mulf %60, %64 : vector<1x16x16xf32>
    %66 = arith.truncf %65 : vector<1x16x16xf32> to vector<1x16x16xbf16>
    "tpu.trace_start"() <{level = 10 : i32, message = "bqk,bkd->bqd"}> : () -> ()
    %cst_24 = arith.constant dense<0.000000e+00> : vector<1x16x32xf32>
    %67 = tpu.matmul %66, %52, %cst_24 {dimension_numbers = #tpu.dot_dimension_numbers<[2], [1], [1], [2], [0, 0, 0, 1, 1, 2], [0], [0]>} : vector<1x16x16xbf16>, vector<1x16x32xbf16>, vector<1x16x32xf32> -> vector<1x16x32xf32>
    "tpu.trace_stop"() : () -> ()
    %68 = vector.shape_cast %67 : vector<1x16x32xf32> to vector<16x32xf32>
    %69 = arith.truncf %68 : vector<16x32xf32> to vector<16x32xbf16>
    %70 = vector.extract_strided_slice %25 {offsets = [32, 0], sizes = [32, 128], strides = [1, 1]} : vector<128x128xbf16> to vector<32x128xbf16>
    %cst_25 = arith.constant dense<0.000000e+00> : vector<16x128xf32>
    %71 = tpu.matmul %69, %70, %cst_25 {dimension_numbers = #tpu.dot_dimension_numbers<[1], [0], [0], [1], [0, 0, 1, 1], [], []>} : vector<16x32xbf16>, vector<32x128xbf16>, vector<16x128xf32> -> vector<16x128xf32>
    %72 = arith.addf %49, %71 : vector<16x128xf32>
    %73 = vector.extract_strided_slice %12 {offsets = [0, 0, 64], sizes = [1, 16, 32], strides = [1, 1, 1]} : vector<1x16x128xbf16> to vector<1x16x32xbf16>
    %74 = vector.extract_strided_slice %15 {offsets = [0, 0, 64], sizes = [1, 16, 32], strides = [1, 1, 1]} : vector<1x16x128xbf16> to vector<1x16x32xbf16>
    %75 = vector.extract_strided_slice %18 {offsets = [0, 0, 64], sizes = [1, 16, 32], strides = [1, 1, 1]} : vector<1x16x128xbf16> to vector<1x16x32xbf16>
    "tpu.trace_start"() <{level = 10 : i32, message = "bqd,bkd->bqk"}> : () -> ()
    %cst_26 = arith.constant dense<0.000000e+00> : vector<1x16x16xf32>
    %76 = tpu.matmul %73, %74, %cst_26 {dimension_numbers = #tpu.dot_dimension_numbers<[2], [2], [1], [1], [0, 0, 0, 1, 1, 1], [0], [0]>} : vector<1x16x32xbf16>, vector<1x16x32xbf16>, vector<1x16x16xf32> -> vector<1x16x16xf32>
    "tpu.trace_stop"() : () -> ()
    %77 = vector.broadcast %24 : vector<1x1x16xf32> to vector<1x16x16xf32>
    %78 = arith.addf %76, %77 : vector<1x16x16xf32>
    %cst_27 = arith.constant dense<0xFF800000> : vector<1x16xf32>
    %79 = vector.multi_reduction <maximumf>, %78, %cst_27 [2] : vector<1x16x16xf32> to vector<1x16xf32>
    %80 = vector.shape_cast %79 : vector<1x16xf32> to vector<1x16x1xf32>
    %81 = vector.broadcast %80 : vector<1x16x1xf32> to vector<1x16x16xf32>
    %82 = arith.subf %78, %81 : vector<1x16x16xf32>
    %83 = math.exp %82 : vector<1x16x16xf32>
    %cst_28 = arith.constant dense<0.000000e+00> : vector<1x16xf32>
    %84 = vector.multi_reduction <add>, %83, %cst_28 [2] : vector<1x16x16xf32> to vector<1x16xf32>
    %85 = vector.shape_cast %84 : vector<1x16xf32> to vector<1x16x1xf32>
    %86 = tpu.reciprocal %85 {approx = true} : vector<1x16x1xf32> -> vector<1x16x1xf32>
    %87 = vector.broadcast %86 : vector<1x16x1xf32> to vector<1x16x16xf32>
    %88 = arith.mulf %83, %87 : vector<1x16x16xf32>
    %89 = arith.truncf %88 : vector<1x16x16xf32> to vector<1x16x16xbf16>
    "tpu.trace_start"() <{level = 10 : i32, message = "bqk,bkd->bqd"}> : () -> ()
    %cst_29 = arith.constant dense<0.000000e+00> : vector<1x16x32xf32>
    %90 = tpu.matmul %89, %75, %cst_29 {dimension_numbers = #tpu.dot_dimension_numbers<[2], [1], [1], [2], [0, 0, 0, 1, 1, 2], [0], [0]>} : vector<1x16x16xbf16>, vector<1x16x32xbf16>, vector<1x16x32xf32> -> vector<1x16x32xf32>
    "tpu.trace_stop"() : () -> ()
    %91 = vector.shape_cast %90 : vector<1x16x32xf32> to vector<16x32xf32>
    %92 = arith.truncf %91 : vector<16x32xf32> to vector<16x32xbf16>
    %93 = vector.extract_strided_slice %25 {offsets = [64, 0], sizes = [32, 128], strides = [1, 1]} : vector<128x128xbf16> to vector<32x128xbf16>
    %cst_30 = arith.constant dense<0.000000e+00> : vector<16x128xf32>
    %94 = tpu.matmul %92, %93, %cst_30 {dimension_numbers = #tpu.dot_dimension_numbers<[1], [0], [0], [1], [0, 0, 1, 1], [], []>} : vector<16x32xbf16>, vector<32x128xbf16>, vector<16x128xf32> -> vector<16x128xf32>
    %95 = arith.addf %72, %94 : vector<16x128xf32>
    %96 = vector.extract_strided_slice %12 {offsets = [0, 0, 96], sizes = [1, 16, 32], strides = [1, 1, 1]} : vector<1x16x128xbf16> to vector<1x16x32xbf16>
    %97 = vector.extract_strided_slice %15 {offsets = [0, 0, 96], sizes = [1, 16, 32], strides = [1, 1, 1]} : vector<1x16x128xbf16> to vector<1x16x32xbf16>
    %98 = vector.extract_strided_slice %18 {offsets = [0, 0, 96], sizes = [1, 16, 32], strides = [1, 1, 1]} : vector<1x16x128xbf16> to vector<1x16x32xbf16>
    "tpu.trace_start"() <{level = 10 : i32, message = "bqd,bkd->bqk"}> : () -> ()
    %cst_31 = arith.constant dense<0.000000e+00> : vector<1x16x16xf32>
    %99 = tpu.matmul %96, %97, %cst_31 {dimension_numbers = #tpu.dot_dimension_numbers<[2], [2], [1], [1], [0, 0, 0, 1, 1, 1], [0], [0]>} : vector<1x16x32xbf16>, vector<1x16x32xbf16>, vector<1x16x16xf32> -> vector<1x16x16xf32>
    "tpu.trace_stop"() : () -> ()
    %100 = vector.broadcast %24 : vector<1x1x16xf32> to vector<1x16x16xf32>
    %101 = arith.addf %99, %100 : vector<1x16x16xf32>
    %cst_32 = arith.constant dense<0xFF800000> : vector<1x16xf32>
    %102 = vector.multi_reduction <maximumf>, %101, %cst_32 [2] : vector<1x16x16xf32> to vector<1x16xf32>
    %103 = vector.shape_cast %102 : vector<1x16xf32> to vector<1x16x1xf32>
    %104 = vector.broadcast %103 : vector<1x16x1xf32> to vector<1x16x16xf32>
    %105 = arith.subf %101, %104 : vector<1x16x16xf32>
    %106 = math.exp %105 : vector<1x16x16xf32>
    %cst_33 = arith.constant dense<0.000000e+00> : vector<1x16xf32>
    %107 = vector.multi_reduction <add>, %106, %cst_33 [2] : vector<1x16x16xf32> to vector<1x16xf32>
    %108 = vector.shape_cast %107 : vector<1x16xf32> to vector<1x16x1xf32>
    %109 = tpu.reciprocal %108 {approx = true} : vector<1x16x1xf32> -> vector<1x16x1xf32>
    %110 = vector.broadcast %109 : vector<1x16x1xf32> to vector<1x16x16xf32>
    %111 = arith.mulf %106, %110 : vector<1x16x16xf32>
    %112 = arith.truncf %111 : vector<1x16x16xf32> to vector<1x16x16xbf16>
    "tpu.trace_start"() <{level = 10 : i32, message = "bqk,bkd->bqd"}> : () -> ()
    %cst_34 = arith.constant dense<0.000000e+00> : vector<1x16x32xf32>
    %113 = tpu.matmul %112, %98, %cst_34 {dimension_numbers = #tpu.dot_dimension_numbers<[2], [1], [1], [2], [0, 0, 0, 1, 1, 2], [0], [0]>} : vector<1x16x16xbf16>, vector<1x16x32xbf16>, vector<1x16x32xf32> -> vector<1x16x32xf32>
    "tpu.trace_stop"() : () -> ()
    %114 = vector.shape_cast %113 : vector<1x16x32xf32> to vector<16x32xf32>
    %115 = arith.truncf %114 : vector<16x32xf32> to vector<16x32xbf16>
    %116 = vector.extract_strided_slice %25 {offsets = [96, 0], sizes = [32, 128], strides = [1, 1]} : vector<128x128xbf16> to vector<32x128xbf16>
    %cst_35 = arith.constant dense<0.000000e+00> : vector<16x128xf32>
    %117 = tpu.matmul %115, %116, %cst_35 {dimension_numbers = #tpu.dot_dimension_numbers<[1], [0], [0], [1], [0, 0, 1, 1], [], []>} : vector<16x32xbf16>, vector<32x128xbf16>, vector<16x128xf32> -> vector<16x128xf32>
    %118 = arith.addf %95, %117 : vector<16x128xf32>
    %c0_36 = arith.constant 0 : index
    %c0_37 = arith.constant 0 : index
    %119 = vector.load %arg7[%c0_36, %c0_37] : memref<1x128xf32, #tpu.memory_space<vmem>>, vector<1x128xf32>
    %120 = vector.broadcast %119 : vector<1x128xf32> to vector<16x128xf32>
    %121 = arith.addf %118, %120 : vector<16x128xf32>
    %122 = arith.addf %1, %121 : vector<16x128xf32>
    %c0_38 = arith.constant 0 : index
    %c0_39 = arith.constant 0 : index
    %123 = vector.load %arg8[%c0_38, %c0_39] : memref<1x128xf32, #tpu.memory_space<vmem>>, vector<1x128xf32>
    %c0_40 = arith.constant 0 : index
    %c0_41 = arith.constant 0 : index
    %124 = vector.load %arg9[%c0_40, %c0_41] : memref<1x128xf32, #tpu.memory_space<vmem>>, vector<1x128xf32>
    %cst_42 = arith.constant dense<0.000000e+00> : vector<16xf32>
    %125 = vector.multi_reduction <add>, %122, %cst_42 [1] : vector<16x128xf32> to vector<16xf32>
    %126 = vector.shape_cast %125 : vector<16xf32> to vector<16x1xf32>
    %cst_43 = arith.constant 1.280000e+02 : f32
    %127 = vector.broadcast %cst_43 : f32 to vector<16x1xf32>
    %128 = arith.divf %126, %127 : vector<16x1xf32>
    %129 = vector.broadcast %128 : vector<16x1xf32> to vector<16x128xf32>
    %130 = arith.subf %122, %129 : vector<16x128xf32>
    %131 = arith.mulf %130, %130 : vector<16x128xf32>
    %cst_44 = arith.constant dense<0.000000e+00> : vector<16xf32>
    %132 = vector.multi_reduction <add>, %131, %cst_44 [1] : vector<16x128xf32> to vector<16xf32>
    %133 = vector.shape_cast %132 : vector<16xf32> to vector<16x1xf32>
    %cst_45 = arith.constant 1.280000e+02 : f32
    %134 = vector.broadcast %cst_45 : f32 to vector<16x1xf32>
    %135 = arith.divf %133, %134 : vector<16x1xf32>
    %136 = vector.broadcast %128 : vector<16x1xf32> to vector<16x128xf32>
    %137 = arith.subf %122, %136 : vector<16x128xf32>
    %cst_46 = arith.constant 9.99999974E-6 : f32
    %138 = vector.broadcast %cst_46 : f32 to vector<16x1xf32>
    %139 = arith.addf %135, %138 : vector<16x1xf32>
    %140 = math.rsqrt %139 : vector<16x1xf32>
    %141 = vector.broadcast %140 : vector<16x1xf32> to vector<16x128xf32>
    %142 = arith.mulf %137, %141 : vector<16x128xf32>
    %143 = vector.broadcast %123 : vector<1x128xf32> to vector<16x128xf32>
    %144 = arith.mulf %142, %143 : vector<16x128xf32>
    %145 = vector.broadcast %124 : vector<1x128xf32> to vector<16x128xf32>
    %146 = arith.addf %144, %145 : vector<16x128xf32>
    %147 = arith.addf %1, %146 : vector<16x128xf32>
    %c0_47 = arith.constant 0 : index
    %c0_48 = arith.constant 0 : index
    %148 = vector.load %arg10[%c0_47, %c0_48] : memref<1x128xf32, #tpu.memory_space<vmem>>, vector<1x128xf32>
    %c0_49 = arith.constant 0 : index
    %c0_50 = arith.constant 0 : index
    %149 = vector.load %arg11[%c0_49, %c0_50] : memref<1x128xf32, #tpu.memory_space<vmem>>, vector<1x128xf32>
    %cst_51 = arith.constant dense<0.000000e+00> : vector<16xf32>
    %150 = vector.multi_reduction <add>, %147, %cst_51 [1] : vector<16x128xf32> to vector<16xf32>
    %151 = vector.shape_cast %150 : vector<16xf32> to vector<16x1xf32>
    %cst_52 = arith.constant 1.280000e+02 : f32
    %152 = vector.broadcast %cst_52 : f32 to vector<16x1xf32>
    %153 = arith.divf %151, %152 : vector<16x1xf32>
    %154 = vector.broadcast %153 : vector<16x1xf32> to vector<16x128xf32>
    %155 = arith.subf %147, %154 : vector<16x128xf32>
    %156 = arith.mulf %155, %155 : vector<16x128xf32>
    %cst_53 = arith.constant dense<0.000000e+00> : vector<16xf32>
    %157 = vector.multi_reduction <add>, %156, %cst_53 [1] : vector<16x128xf32> to vector<16xf32>
    %158 = vector.shape_cast %157 : vector<16xf32> to vector<16x1xf32>
    %cst_54 = arith.constant 1.280000e+02 : f32
    %159 = vector.broadcast %cst_54 : f32 to vector<16x1xf32>
    %160 = arith.divf %158, %159 : vector<16x1xf32>
    %161 = vector.broadcast %153 : vector<16x1xf32> to vector<16x128xf32>
    %162 = arith.subf %147, %161 : vector<16x128xf32>
    %cst_55 = arith.constant 9.99999974E-6 : f32
    %163 = vector.broadcast %cst_55 : f32 to vector<16x1xf32>
    %164 = arith.addf %160, %163 : vector<16x1xf32>
    %165 = math.rsqrt %164 : vector<16x1xf32>
    %166 = vector.broadcast %165 : vector<16x1xf32> to vector<16x128xf32>
    %167 = arith.mulf %162, %166 : vector<16x128xf32>
    %168 = vector.broadcast %148 : vector<1x128xf32> to vector<16x128xf32>
    %169 = arith.mulf %167, %168 : vector<16x128xf32>
    %170 = vector.broadcast %149 : vector<1x128xf32> to vector<16x128xf32>
    %171 = arith.addf %169, %170 : vector<16x128xf32>
    %c0_56 = arith.constant 0 : index
    %c0_57 = arith.constant 0 : index
    %c0_58 = arith.constant 0 : index
    %172 = vector.load %arg2[%c0_56, %c0_57, %c0_58] : memref<1x16x1xf32, #tpu.memory_space<vmem>>, vector<1x16x1xf32>
    %173 = vector.shape_cast %172 : vector<1x16x1xf32> to vector<16x1xf32>
    %174 = vector.broadcast %173 : vector<16x1xf32> to vector<16x128xf32>
    %175 = arith.mulf %171, %174 : vector<16x128xf32>
    %176 = arith.truncf %175 : vector<16x128xf32> to vector<16x128xbf16>
    %c0_59 = arith.constant 0 : index
    %c0_60 = arith.constant 0 : index
    %177 = vector.load %arg12[%c0_59, %c0_60] : memref<128x256xbf16, #tpu.memory_space<vmem>>, vector<128x256xbf16>
    %cst_61 = arith.constant dense<0.000000e+00> : vector<16x256xf32>
    %178 = tpu.matmul %176, %177, %cst_61 {dimension_numbers = #tpu.dot_dimension_numbers<[1], [0], [0], [1], [0, 0, 1, 1], [], []>} : vector<16x128xbf16>, vector<128x256xbf16>, vector<16x256xf32> -> vector<16x256xf32>
    %c0_62 = arith.constant 0 : index
    %c0_63 = arith.constant 0 : index
    %179 = vector.load %arg13[%c0_62, %c0_63] : memref<1x256xf32, #tpu.memory_space<vmem>>, vector<1x256xf32>
    %180 = vector.broadcast %179 : vector<1x256xf32> to vector<16x256xf32>
    %181 = arith.addf %178, %180 : vector<16x256xf32>
    %cst_64 = arith.constant 0.000000e+00 : f32
    %182 = vector.broadcast %cst_64 : f32 to vector<16x256xf32>
    %183 = arith.maximumf %181, %182 : vector<16x256xf32>
    %184 = arith.truncf %183 : vector<16x256xf32> to vector<16x256xbf16>
    %c0_65 = arith.constant 0 : index
    %c0_66 = arith.constant 0 : index
    %185 = vector.load %arg14[%c0_65, %c0_66] : memref<256x128xbf16, #tpu.memory_space<vmem>>, vector<256x128xbf16>
    %cst_67 = arith.constant dense<0.000000e+00> : vector<16x128xf32>
    %186 = tpu.matmul %184, %185, %cst_67 {dimension_numbers = #tpu.dot_dimension_numbers<[1], [0], [0], [1], [0, 0, 1, 1], [], []>} : vector<16x256xbf16>, vector<256x128xbf16>, vector<16x128xf32> -> vector<16x128xf32>
    %c0_68 = arith.constant 0 : index
    %c0_69 = arith.constant 0 : index
    %187 = vector.load %arg15[%c0_68, %c0_69] : memref<1x128xf32, #tpu.memory_space<vmem>>, vector<1x128xf32>
    %188 = vector.broadcast %187 : vector<1x128xf32> to vector<16x128xf32>
    %189 = arith.addf %186, %188 : vector<16x128xf32>
    %190 = arith.addf %175, %189 : vector<16x128xf32>
    %c0_70 = arith.constant 0 : index
    %c0_71 = arith.constant 0 : index
    %191 = vector.load %arg16[%c0_70, %c0_71] : memref<1x128xf32, #tpu.memory_space<vmem>>, vector<1x128xf32>
    %c0_72 = arith.constant 0 : index
    %c0_73 = arith.constant 0 : index
    %192 = vector.load %arg17[%c0_72, %c0_73] : memref<1x128xf32, #tpu.memory_space<vmem>>, vector<1x128xf32>
    %cst_74 = arith.constant dense<0.000000e+00> : vector<16xf32>
    %193 = vector.multi_reduction <add>, %190, %cst_74 [1] : vector<16x128xf32> to vector<16xf32>
    %194 = vector.shape_cast %193 : vector<16xf32> to vector<16x1xf32>
    %cst_75 = arith.constant 1.280000e+02 : f32
    %195 = vector.broadcast %cst_75 : f32 to vector<16x1xf32>
    %196 = arith.divf %194, %195 : vector<16x1xf32>
    %197 = vector.broadcast %196 : vector<16x1xf32> to vector<16x128xf32>
    %198 = arith.subf %190, %197 : vector<16x128xf32>
    %199 = arith.mulf %198, %198 : vector<16x128xf32>
    %cst_76 = arith.constant dense<0.000000e+00> : vector<16xf32>
    %200 = vector.multi_reduction <add>, %199, %cst_76 [1] : vector<16x128xf32> to vector<16xf32>
    %201 = vector.shape_cast %200 : vector<16xf32> to vector<16x1xf32>
    %cst_77 = arith.constant 1.280000e+02 : f32
    %202 = vector.broadcast %cst_77 : f32 to vector<16x1xf32>
    %203 = arith.divf %201, %202 : vector<16x1xf32>
    %204 = vector.broadcast %196 : vector<16x1xf32> to vector<16x128xf32>
    %205 = arith.subf %190, %204 : vector<16x128xf32>
    %cst_78 = arith.constant 9.99999974E-6 : f32
    %206 = vector.broadcast %cst_78 : f32 to vector<16x1xf32>
    %207 = arith.addf %203, %206 : vector<16x1xf32>
    %208 = math.rsqrt %207 : vector<16x1xf32>
    %209 = vector.broadcast %208 : vector<16x1xf32> to vector<16x128xf32>
    %210 = arith.mulf %205, %209 : vector<16x128xf32>
    %211 = vector.broadcast %191 : vector<1x128xf32> to vector<16x128xf32>
    %212 = arith.mulf %210, %211 : vector<16x128xf32>
    %213 = vector.broadcast %192 : vector<1x128xf32> to vector<16x128xf32>
    %214 = arith.addf %212, %213 : vector<16x128xf32>
    %215 = vector.broadcast %173 : vector<16x1xf32> to vector<16x128xf32>
    %216 = arith.mulf %214, %215 : vector<16x128xf32>
    %217 = vector.shape_cast %216 : vector<16x128xf32> to vector<1x16x128xf32>
    %c0_79 = arith.constant 0 : index
    %c0_80 = arith.constant 0 : index
    %c0_81 = arith.constant 0 : index
    %218 = vector.load %arg18[%c0_79, %c0_80, %c0_81] : memref<1x16x128xf32, #tpu.memory_space<vmem>>, vector<1x16x128xf32>
    tpu.vector_store %arg18[%c0_79, %c0_80, %c0_81], %217 {strides = array<i32>} : memref<1x16x128xf32, #tpu.memory_space<vmem>>, vector<1x16x128xf32>,
    return
  }
  func.func @transform_0(%arg0: i32) -> (i32, i32, i32) {
    %c0_i32 = arith.constant 0 : i32
    %c0_i32_0 = arith.constant 0 : i32
    %c0_i32_1 = arith.constant 0 : i32
    return %arg0, %c0_i32, %c0_i32_0 : i32, i32, i32
  }
  func.func @transform_1(%arg0: i32) -> (i32, i32, i32) {
    %c0_i32 = arith.constant 0 : i32
    %c0_i32_0 = arith.constant 0 : i32
    %c0_i32_1 = arith.constant 0 : i32
    return %arg0, %c0_i32, %c0_i32_0 : i32, i32, i32
  }
  func.func @transform_2(%arg0: i32) -> (i32, i32, i32) {
    %c0_i32 = arith.constant 0 : i32
    %c0_i32_0 = arith.constant 0 : i32
    %c0_i32_1 = arith.constant 0 : i32
    return %arg0, %c0_i32, %c0_i32_0 : i32, i32, i32
  }
  func.func @transform_3(%arg0: i32) -> (i32, i32) {
    %c0_i32 = arith.constant 0 : i32
    %c0_i32_0 = arith.constant 0 : i32
    %c0_i32_1 = arith.constant 0 : i32
    return %c0_i32, %c0_i32_0 : i32, i32
  }
  func.func @transform_4(%arg0: i32) -> (i32, i32) {
    %c0_i32 = arith.constant 0 : i32
    %c0_i32_0 = arith.constant 0 : i32
    %c0_i32_1 = arith.constant 0 : i32
    return %c0_i32, %c0_i32_0 : i32, i32
  }
  func.func @transform_5(%arg0: i32) -> (i32, i32) {
    %c0_i32 = arith.constant 0 : i32
    %c0_i32_0 = arith.constant 0 : i32
    %c0_i32_1 = arith.constant 0 : i32
    return %c0_i32, %c0_i32_0 : i32, i32
  }
  func.func @transform_6(%arg0: i32) -> (i32, i32) {
    %c0_i32 = arith.constant 0 : i32
    %c0_i32_0 = arith.constant 0 : i32
    %c0_i32_1 = arith.constant 0 : i32
    return %c0_i32, %c0_i32_0 : i32, i32
  }
  func.func @transform_7(%arg0: i32) -> (i32, i32) {
    %c0_i32 = arith.constant 0 : i32
    %c0_i32_0 = arith.constant 0 : i32
    %c0_i32_1 = arith.constant 0 : i32
    return %c0_i32, %c0_i32_0 : i32, i32
  }
  func.func @transform_8(%arg0: i32) -> (i32, i32) {
    %c0_i32 = arith.constant 0 : i32
    %c0_i32_0 = arith.constant 0 : i32
    %c0_i32_1 = arith.constant 0 : i32
    return %c0_i32, %c0_i32_0 : i32, i32
  }
  func.func @transform_9(%arg0: i32) -> (i32, i32) {
    %c0_i32 = arith.constant 0 : i32
    %c0_i32_0 = arith.constant 0 : i32
    %c0_i32_1 = arith.constant 0 : i32
    return %c0_i32, %c0_i32_0 : i32, i32
  }
  func.func @transform_10(%arg0: i32) -> (i32, i32) {
    %c0_i32 = arith.constant 0 : i32
    %c0_i32_0 = arith.constant 0 : i32
    %c0_i32_1 = arith.constant 0 : i32
    return %c0_i32, %c0_i32_0 : i32, i32
  }
  func.func @transform_11(%arg0: i32) -> (i32, i32) {
    %c0_i32 = arith.constant 0 : i32
    %c0_i32_0 = arith.constant 0 : i32
    %c0_i32_1 = arith.constant 0 : i32
    return %c0_i32, %c0_i32_0 : i32, i32
  }
  func.func @transform_12(%arg0: i32) -> (i32, i32) {
    %c0_i32 = arith.constant 0 : i32
    %c0_i32_0 = arith.constant 0 : i32
    %c0_i32_1 = arith.constant 0 : i32
    return %c0_i32, %c0_i32_0 : i32, i32
  }
  func.func @transform_13(%arg0: i32) -> (i32, i32) {
    %c0_i32 = arith.constant 0 : i32
    %c0_i32_0 = arith.constant 0 : i32
    %c0_i32_1 = arith.constant 0 : i32
    return %c0_i32, %c0_i32_0 : i32, i32
  }
  func.func @transform_14(%arg0: i32) -> (i32, i32) {
    %c0_i32 = arith.constant 0 : i32
    %c0_i32_0 = arith.constant 0 : i32
    %c0_i32_1 = arith.constant 0 : i32
    return %c0_i32, %c0_i32_0 : i32, i32
  }
  func.func @transform_15(%arg0: i32) -> (i32, i32) {
    %c0_i32 = arith.constant 0 : i32
    %c0_i32_0 = arith.constant 0 : i32
    %c0_i32_1 = arith.constant 0 : i32
    return %c0_i32, %c0_i32_0 : i32, i32
  }
  func.func @transform_16(%arg0: i32) -> (i32, i32) {
    %c0_i32 = arith.constant 0 : i32
    %c0_i32_0 = arith.constant 0 : i32
    %c0_i32_1 = arith.constant 0 : i32
    return %c0_i32, %c0_i32_0 : i32, i32
  }
  func.func @transform_17(%arg0: i32) -> (i32, i32, i32) {
    %c0_i32 = arith.constant 0 : i32
    %c0_i32_0 = arith.constant 0 : i32
    %c0_i32_1 = arith.constant 0 : i32
    return %arg0, %c0_i32, %c0_i32_0 : i32, i32, i32
  }
}

</mosaic_0001>

<bundles_post_ra>
// kernel: tpu_custom_call.1
= control target key start
LH: loop header
LB: loop body
LE: loop exit
PB: predicated region body
PF: predicated region fallthrough
CT: control target
= control target key end

     0   :  { %s3446_s0 = inlined_call_operand.vmem [shape: f32[2,16,128], index: 0, kind: input, shape index: {}]   ;;  %s3447_s1 = inlined_call_operand.vmem [shape: f32[2,16,1], index: 1, kind: input, shape index: {}]   ;;  %s3448_s2 = inlined_call_operand.vmem [shape: f32[2,1,16], index: 2, kind: input, shape index: {}]   ;;  %s3449_s3 = inlined_call_operand.hbm [shape: bf16[128,384], index: 3, kind: input, shape index: {}]   ;;  %s3450_s4 = inlined_call_operand.vmem [shape: f32[1,384], index: 4, kind: input, shape index: {}]   ;;  %s3451_s5 = inlined_call_operand.hbm [shape: bf16[128,128], index: 5, kind: input, shape index: {}]   ;;  %s3452_s6 = inlined_call_operand.vmem [shape: f32[1,128], index: 6, kind: input, shape index: {}]   ;;  %s3453_s7 = inlined_call_operand.vmem [shape: f32[1,128], index: 7, kind: input, shape index: {}]   ;;  %s3454_s8 = inlined_call_operand.vmem [shape: f32[1,128], index: 8, kind: input, shape index: {}]   ;;  %s3455_s9 = inlined_call_operand.vmem [shape: f32[1,128], index: 9, kind: input, shape index: {}]   ;;  %s3456_s10 = inlined_call_operand.vmem [shape: f32[1,128], index: 10, kind: input, shape index: {}]   ;;  %s3457_s11 = inlined_call_operand.hbm [shape: bf16[128,256], index: 11, kind: input, shape index: {}]   ;;  %s3458_s12 = inlined_call_operand.vmem [shape: f32[1,256], index: 12, kind: input, shape index: {}]   ;;  %s3459_s13 = inlined_call_operand.hbm [shape: bf16[256,128], index: 13, kind: input, shape index: {}]   ;;  %s3460_s14 = inlined_call_operand.vmem [shape: f32[1,128], index: 14, kind: input, shape index: {}]   ;;  %s3461_s15 = inlined_call_operand.vmem [shape: f32[1,128], index: 15, kind: input, shape index: {}]   ;;  %s3462_s16 = inlined_call_operand.vmem [shape: f32[1,128], index: 16, kind: input, shape index: {}]   ;;  %s3463_s17 = inlined_call_operand.hbm [shape: f32[2,16,128], index: 17, kind: output, shape index: {}]  }
   0x1   :  { %3472 = sst [smem:[#allocation21_spill]] %s3446_s0 }
   0x2   :  { %3473 = sst [smem:[#allocation22_spill]] %s3447_s1 }
   0x3   :  { %3474 = sst [smem:[#allocation23_spill]] %s3463_s17 }
   0x4   :  { %22 = vsyncpa [#allocation3], 0 }
   0x5   :  { %23 = vsyncpa [#allocation6], 0 }
   0x6   :  { %24 = vsyncpa [#allocation9], 0 }
   0x7   :  { %25 = vsyncpa [#allocation4], 0 }
   0x8   :  { %27 = vsyncpa [#allocation4 + $0x1], 0  ;;  %s3050_s24 = smov 0   ;;  %s3052_s25 = smov 0  }
   0x9   :  { %s3054_s26 = smov 0   ;;  %s3056_s27 = smov 0  }
   0xa LB: > { %3475 = sst [smem:[#allocation15_spill]] %s2927_s24  ;;  %s3071_s28 = sadd.s32 4294967295, %s2939_s27   ;;  %s2939_s27 = sphi %s3056_s27, %s3493_s27   ;;  %s2935_s26 = sphi %s3054_s26, %s3495_s26   ;;  %s2931_s25 = sphi %s3052_s25, %s3497_s25   ;;  %s2927_s24 = sphi %s3050_s24, %s3496_s24  }
   0xb   : > { %3476 = sst [smem:[#allocation16_spill]] %s2935_s26  ;;  %s2275_s29 = sadd.s32 4294967294, %s2939_s27  }
   0xc   : > { %3477 = sst [smem:[#allocation17_spill]] %s2939_s27  ;;  %s3075_s0 = sadd.s32 1, %s2939_s27  }
   0xd   : > { %3478 = sst [smem:[#allocation18_spill]] %s3075_s0  ;;  %s412_s30 = sadd.s32 1, %s2935_s26 }
   0xe   : > { %s409_s18 = ssub.s32 %s2939_s27, %s3075_s0  ;;  %p422_p0 = scmp.ne.s32.totalorder %s2935_s26, %s2931_s25 }
   0xf   : > { %p410_p1 = scmp.eq.s32.totalorder %s409_s18, 0  ;;  %p423_p2 = scmp.eq.s32.totalorder %s3071_s28, 1 }
  0x10   : > { %p428_p3 = scmp.ne.s32.totalorder %s2931_s25, %s2927_s24  ;;  %p429_p4 = scmp.eq.s32.totalorder %s2275_s29, 1 }
  0x11   : > { %s3086_s19 = scalar_select %p410_p1, %s2935_s26, %s412_s30  }
  0x12   : > { %p3088_p5 = por %p423_p2, %p422_p0  ;;  %p3092_p6 = por %p429_p4, %p428_p3 }
  0x13   : > { %3479 = sst [smem:[#allocation19_spill]] %s3086_s19  ;;  %p2276_p7 = scmp.ge.s32.totalorder %s2939_s27, 1 }
  0x14   : > { %s3481_s20 = scalar_select %p3092_p6, 1, 0 }
  0x15   : > { %p436_p8 = scmp.lt.s32.totalorder %s2939_s27, 3  ;;  %p2578_p9 = scmp.eq.s32.totalorder %s3071_s28, 0 }
  0x16   : > { %3482 = sst [smem:[#allocation20_spill]] %s3481_s20  ;;  %s2941_s22 = smov [#allocation5]  }
  0x17   : > { %p3099_p10 = pnand %p2276_p7, %p436_p8  ;;  %s464_s23 = sshll.u32 %s2941_s22, 4  ;;  %s465_s23 = int_to_ptr.vmem [resolvable:$true] %s464_s23 }
  0x18   : > { %s2942_s30 = smov [#allocation2]   ;;  %s2774_s19 = scalar_lea.vmem %s465_s23, 1024 }
  0x19   : > { %p2561_p11 = pneg %p3099_p10  ;;  %s448_s18 = sshll.u32 %s2942_s30, 4  ;;  %s449_s18 = int_to_ptr.vmem [resolvable:$true] %s448_s18 }
  0x1a   : > { %p2775_p0 = scmp.ne.s32.totalorder %s465_s23, %s2774_s19  ;;  %p2782_p3 = scmp.lt.s32.totalorder %s465_s23, %s465_s23 }
  0x1b   : > { %p3107_p12 = pnand %p2578_p9, %p2561_p11  ;;  %p2783_p4 = scmp.lt.s32.totalorder %s2774_s19, %s2774_s19 }
  0x1d   : > { %p2765_p13 = pneg %p3107_p12  ;;  %p2784_p7 = por %p2783_p4, %p2782_p3 }
  0x1f   : > { %p2777_p1 = pnand %p2775_p0, %p2765_p13 }
  0x21   : > { %p2778_p2 = pneg %p2777_p1 }
  0x23   : > { %p2785_p8 = pnand %p2784_p7, %p2778_p2 }
  0x25   : > { %2788 = shalt.err (!%p2785_p8)
}
  0x26   : > { %s3471_s22 = smov 64   ;;  %s2944_s26 = smov 4  }
  0x27   : > { %2567 = dma.hbm_to_vmem [thread:$0]  (!%p3107_p12), %s3451_s5, 1024, %s465_s23, [#allocation6], %s3471_s22, %s3471_s22, %s2944_s26  }
  0x28   : > { %s2800_s20 = scalar_lea.vmem %s449_s18, 3072  ;;  %p2808_p2 = scmp.lt.s32.totalorder %s449_s18, %s449_s18 }
  0x29   : > { %p2801_p11 = scmp.ne.s32.totalorder %s449_s18, %s2800_s20  ;;  %p2809_p3 = scmp.lt.s32.totalorder %s2800_s20, %s2800_s20 }
  0x2b   : > { %p2803_p0 = pnand %p2801_p11, %p2765_p13  ;;  %p2810_p4 = por %p2809_p3, %p2808_p2 }
  0x2d   : > { %p2804_p1 = pneg %p2803_p0 }
  0x2f   : > { %p2811_p7 = pnand %p2810_p4, %p2804_p1 }
  0x31   : > { %2814 = shalt.err (!%p2811_p7)
}
  0x32   : > { %s2945_s19 = smov 192   ;;  %s2946_s24 = smov 12  }
  0x33   : > { %2564 = dma.hbm_to_vmem [thread:$0]  (!%p3107_p12), %s3449_s3, 3072, %s449_s18, [#allocation3], %s2945_s19, %s2945_s19, %s2946_s24  }
  0x34   : > { %s2947_s0 = smov [#allocation7]  }
  0x35   : > { %s492_s23 = sshll.u32 %s2947_s0, 4  ;;  %s493_s23 = int_to_ptr.vmem [resolvable:$true] %s492_s23 }
  0x36   : > { %s2826_s30 = scalar_lea.vmem %s493_s23, 2048  ;;  %p2834_p1 = scmp.lt.s32.totalorder %s493_s23, %s493_s23 }
  0x37   : > { %p2827_p8 = scmp.ne.s32.totalorder %s493_s23, %s2826_s30  ;;  %p2835_p2 = scmp.lt.s32.totalorder %s2826_s30, %s2826_s30 }
  0x39   : > { %p2829_p11 = pnand %p2827_p8, %p2765_p13  ;;  %p2836_p3 = por %p2835_p2, %p2834_p1 }
  0x3b   : > { %p2830_p0 = pneg %p2829_p11 }
  0x3d   : > { %p2837_p4 = pnand %p2836_p3, %p2830_p0 }
  0x3f   : > { %2840 = shalt.err (!%p2837_p4)
}
  0x40   : > { %s2948_s20 = smov 128   ;;  %s2949_s22 = smov 8  }
  0x41   : > { %2570 = dma.hbm_to_vmem [thread:$0]  (!%p3107_p12), %s3457_s11, 2048, %s493_s23, [#allocation6], %s2948_s20, %s2948_s20, %s2949_s22  }
  0x42   : > { %s2950_s27 = smov [#allocation8]  }
  0x43   : > { %s508_s18 = sshll.u32 %s2950_s27, 4  ;;  %s509_s18 = int_to_ptr.vmem [resolvable:$true] %s508_s18 }
  0x44   : > { %s2852_s19 = scalar_lea.vmem %s509_s18, 2048  ;;  %p2860_p0 = scmp.lt.s32.totalorder %s509_s18, %s509_s18 }
  0x45   : > { %p2853_p7 = scmp.ne.s32.totalorder %s509_s18, %s2852_s19  ;;  %p2861_p1 = scmp.lt.s32.totalorder %s2852_s19, %s2852_s19 }
  0x47   : > { %p2855_p8 = pnand %p2853_p7, %p2765_p13  ;;  %p2862_p2 = por %p2861_p1, %p2860_p0 }
  0x49   : > { %p2856_p11 = pneg %p2855_p8 }
  0x4b   : > { %p2863_p3 = pnand %p2862_p2, %p2856_p11 }
  0x4d   : > { %2866 = shalt.err (!%p2863_p3)
}
  0x4e   : > { %s3485_s0 = smov 64   ;;  %555 = sbr.rel (%p3099_p10) target bundleno = 3955 (0xf73), region = 88 }
  0x4f   : > { %2573 = dma.hbm_to_vmem [thread:$0]  (!%p3107_p12), %s3459_s13, 2048, %s509_s18, [#allocation9], %s3485_s0, %s3485_s0, %s2944_s26  }
  0x53   : > { %2910 = dma.done.wait (%p2578_p9), [#allocation3], 3072  }
  0x54   : > { %2912 = vsyncadd (%p2578_p9), [#allocation3], 4294964224 }
  0x55   : > { %2914 = dma.done.wait (%p2578_p9), [#allocation6], 3072  }
  0x56   : > { %2916 = vsyncadd (%p2578_p9), [#allocation6], 4294964224 }
  0x57   : > { %2918 = dma.done.wait (%p2578_p9), [#allocation9], 2048  }
  0x58   : > { %2920 = vsyncadd (%p2578_p9), [#allocation9], 4294965248  ;;  %v2951_v0 = vmov 0   ;;  %v2639_v1 = vld [vmem:[#allocation2 + $0xac] ss:$12 sps:$4 sm:$0xff]   ;;  %p627_p10 = scmp.lt.s32.totalorder %s3071_s28, 1  ;;  %v678_v21 = vlaneseq }
  0x59   : > { %853 = vmatprep.mubr.bf16.mxu0 %v2951_v0  ;;  %2637 = vset.pattern.permute.xlu0 %v2951_v0  ;;  %v2641_v2 = vld [vmem:[#allocation2 + $0xa8] ss:$12 sps:$4 sm:$0xff]   ;;  %v2644_v4 = vld [vmem:[#allocation2 + $0x90] ss:$12 sps:$4 sm:$0xff]   ;;  %v2647_v6 = vld [vmem:[#allocation2 + $0x78] ss:$12 sps:$4 sm:$0xff]  }
  0x5a   : > { %2638 = vset.pattern.permute.xlu1 %v2951_v0  ;;  %821 = vmatprep.subr.bf16.mxu0 %v2639_v1  ;;  %v2642_v3 = vld [vmem:[#allocation2 + $0x94] ss:$12 sps:$4 sm:$0xff]   ;;  %v2645_v5 = vld [vmem:[#allocation2 + $0x7c] ss:$12 sps:$4 sm:$0xff]   ;;  %s3170_s26 = scalar_select %p627_p10, %s3071_s28, 1  ;;  %v2952_v20 = vmov 0.0  }
  0x5b   : > { %822 = vmatpush1.bf16.msra.mxu0 %v2641_v2  ;;  %v2648_v7 = vld [vmem:[#allocation2 + $0x64] ss:$12 sps:$4 sm:$0xff]   ;;  %v2650_v8 = vld [vmem:[#allocation2 + $0x60] ss:$12 sps:$4 sm:$0xff]   ;;  %v2653_v10 = vld [vmem:[#allocation2 + $0x48] ss:$12 sps:$4 sm:$0xff]   ;;  %2443 = vmatprep.subr.bf16.mxu1 %v2952_v20 }
  0x5c   : > { %823 = vmatprep.subr.bf16.mxu0 %v2642_v3  ;;  %v2651_v9 = vld [vmem:[#allocation2 + $0x4c] ss:$12 sps:$4 sm:$0xff]   ;;  %s2381_s21 = sshll.u32 %s3170_s26, 4  ;;  %v2654_v11 = vld [vmem:[#allocation2 + $0x34] ss:$12 sps:$4 sm:$0xff]   ;;  %s3486_s20 = sld [smem:[#allocation21_spill]] }
  0x5d   : > { %v2656_v12 = vld [vmem:[#allocation2 + $0x30] ss:$12 sps:$4 sm:$0xff]   ;;  %v2659_v14 = vld [vmem:[#allocation2 + $0x18] ss:$12 sps:$4 sm:$0xff]   ;;  %v2662_v16 = vld [vmem:[#allocation2] ss:$12 sps:$4 sm:$0xff]   ;;  %s639_s22 = scalar_lea.vmem %s3448_s2, %s3170_s26 }
  0x5e   : > { %v2657_v13 = vld [vmem:[#allocation2 + $0x1c] ss:$12 sps:$4 sm:$0xff]   ;;  %v2660_v15 = vld [vmem:[#allocation2 + $0x4] ss:$12 sps:$4 sm:$0xff]   ;;  %vm2953_vm0 = vmmov 0   ;;  %v3190_v22 = vshrl.u32 %v678_v21, 7 }
  0x5f   : > { %824 = vmatpush1.bf16.msra.mxu0 %v2644_v4  ;;  %2459 = vmatprep.mubr.msk.bf16.mxu1 %vm2953_vm0, %v2952_v20  ;;  %v3199_v25 = vld [vmem:[%s3450_s4] sm:$0x7]  ;;  %vm935_vm1 = vcmask 261120   ;;  %s2954_s18 = smov 96   ;;  %v2663_v41 = vld [vmem:[#allocation2 + $0xb0] ss:$12 sps:$4 sm:$0xff]  }
  0x60   : > { %825 = vmatprep.subr.bf16.mxu0 %v2645_v5  ;;  %v3193_v23 = vsub.s32 0, %v3190_v22  ;;  %v684_v24 = vsub.s32 1, %v3190_v22  ;;  %2444 = vmatpush3.bf16.msra.mxu1 %v2663_v41  ;;  %v2664_v42 = vld [vmem:[#allocation2 + $0x98] ss:$12 sps:$4 sm:$0xff]   ;;  %v2665_v43 = vld [vmem:[#allocation2 + $0x80] ss:$12 sps:$4 sm:$0xff]  }
  0x61   : > { %2445 = vmatprep.subr.bf16.mxu1 %v2952_v20  ;;  %v2666_v44 = vld [vmem:[#allocation2 + $0x68] ss:$12 sps:$4 sm:$0xff]   ;;  %v2667_v45 = vld [vmem:[#allocation2 + $0x50] ss:$12 sps:$4 sm:$0xff]   ;;  %v2668_v46 = vld [vmem:[#allocation2 + $0x38] ss:$12 sps:$4 sm:$0xff]  }
  0x62   : > { %s631_s17 = scalar_lea.vmem %s3486_s20, %s2381_s21  ;;  %v681_v28 = vrot.slane %v3199_v25, %v3193_v23  ;;  %v685_v29 = vrot.slane %v3199_v25, %v684_v24  ;;  %v2669_v47 = vld [vmem:[#allocation2 + $0x20] ss:$12 sps:$4 sm:$0xff]   ;;  %v2670_v48 = vld [vmem:[#allocation2 + $0x8] ss:$12 sps:$4 sm:$0xff]   ;;  %vm983_vm3 = vcmask 130048   ;;  %s2955_s23 = smov 64  }
  0x63   : > { %826 = vmatpush1.bf16.msra.mxu0 %v2647_v6  ;;  %v3178_v17 = vld [vmem:[%s631_s17] sm:$0xff]  ;;  %v3180_v18 = vld [vmem:[%s631_s17 + $0x8] sm:$0xff]  ;;  %s2956_s29 = smov 32   ;;  %s624_s0 = sand.u32 1, %s2931_s25  }
  0x64   : > { %827 = vmatprep.subr.bf16.mxu0 %v2648_v7  ;;  %v643_v19 = vpack.c.bf16 %v3180_v18, %v3178_v17  ;;  %2446 = vmatpush3.bf16.msra.mxu1 %v2664_v42  ;;  %v910_v52 = vld [vmem:[%s639_s22] sm:$0x1]  ;;  %s3487_s22 = sld [smem:[#allocation22_spill]]  ;;  %s2287_s26 = sshll.u32 %s624_s0, 4 }
  0x65   : > { %2447 = vmatprep.subr.bf16.mxu1 %v2952_v20  ;;  %vm911_vm2 = vcmp.gt.f32.partialorder %v910_v52, 0.0  ;;  %v2673_v52 = vld [vmem:[#allocation5 + $0x18] sm:$0xff]   ;;  %s3488_s24 = sld [smem:[#allocation23_spill]]  ;;  %s3406_s19 = scalar_lea.sflag [#allocation4], %s624_s0 }
  0x66   : > { %v912_v53 = vsel %vm911_vm2, -1e+30, %v2952_v20 }
  0x67   : > { %828 = vmatpush1.bf16.msra.mxu0 %v2650_v8  ;;  %v3242_v54 = vrot.slane %v912_v53, %v3193_v23 }
  0x68   : > { %829 = vmatprep.subr.bf16.mxu0 %v2651_v9  ;;  %2448 = vmatpush3.bf16.msra.mxu1 %v2665_v43 }
  0x69   : > { %2449 = vmatprep.subr.bf16.mxu1 %v2952_v20 }
  0x6b   : > { %830 = vmatpush1.bf16.msra.mxu0 %v2653_v10 }
  0x6c   : > { %831 = vmatprep.subr.bf16.mxu0 %v2654_v11  ;;  %2450 = vmatpush3.bf16.msra.mxu1 %v2666_v44 }
  0x6d   : > { %2451 = vmatprep.subr.bf16.mxu1 %v2952_v20 }
  0x6f   : > { %832 = vmatpush1.bf16.msra.mxu0 %v2656_v12 }
  0x70   : > { %833 = vmatprep.subr.bf16.mxu0 %v2657_v13  ;;  %2452 = vmatpush3.bf16.msra.mxu1 %v2667_v45 }
  0x71   : > { %2453 = vmatprep.subr.bf16.mxu1 %v2952_v20 }
  0x73   : > { %834 = vmatpush1.bf16.msra.mxu0 %v2659_v14  ;;  %v688_v14 = vsub.s32 2, %v3190_v22  ;;  %v2357_v22 = vld [vmem:[%s3460_s14] ss:$0 sm:$0xff] }
  0x74   : > { %835 = vmatprep.subr.bf16.mxu0 %v2660_v15  ;;  %2454 = vmatpush3.bf16.msra.mxu1 %v2668_v46 }
  0x75   : > { %2455 = vmatprep.subr.bf16.mxu1 %v2952_v20 }
  0x77   : > { %836 = vmatpush1.bf16.msra.mxu0 %v2662_v16  ;;  %v689_v16 = vrot.slane %v3199_v25, %v688_v14 }
  0x78   : > { %2463 = vmatprep.subr.bf16.mxu0 %v2952_v20  ;;  %2456 = vmatpush3.bf16.msra.mxu1 %v2669_v47 }
  0x79   : > { %2457 = vmatprep.subr.bf16.mxu1 %v2952_v20 }
  0x7a   : > { %854 = vmatmul.mubr.bf16.vlgmr.msra.gmra.mxu0 %v643_v19 }
  0x7b   : > { %2465 = vmatprep.mubr.msk.bf16.mxu0 %vm2953_vm0, %v2952_v20 }
  0x7c   : > { %2458 = vmatpush3.bf16.msra.mxu1 %v2670_v48 }
  0x7d   : > { %2469 = vmatprep.subr.bf16.mxu1 %v2952_v20 }
  0x7f   : > { %2460 = vmatmul.mubr.bf16.vlgmr.msra.gmra.mxu1 %v643_v19 }
  0x80   : > { %2471 = vmatprep.mubr.msk.bf16.mxu1 %vm2953_vm0, %v2952_v20 }
 0x13a   : > { %v855_v26 = vpop.f32.mrf.mxu0 }
 0x13b   : > { %v856_v33 = vadd.f32 %v855_v26, %v681_v28 }
 0x13c   : > { %v857_v27 = vpop.f32.mrf.mxu0 }
 0x13d   : > { %v858_v34 = vadd.f32 %v857_v27, %v685_v29  ;;  %v905_v38 = vmul.f32 0.17677669, %v856_v33 }
 0x13e   : > { %v859_v30 = vpop.f32.mrf.mxu0 }
 0x13f   : > { %v860_v31 = vadd.f32 %v859_v30, %v681_v28  ;;  %v898_v15 = vpop.f32.mrf.mxu1 }
 0x140   : > { %v861_v32 = vpop.f32.mrf.mxu0  ;;  %v899_v21 = vadd.f32 %v898_v15, %v689_v16 }
 0x141   : > { %v862_v35 = vadd.f32 %v861_v32, %v685_v29  ;;  %v906_v36 = vmul.f32 0.17677669, %v860_v31  ;;  %v2461_v19 = vpop.f32.mrf.mxu1 }
 0x143   : > { %v3206_v37 = vpack.c.bf16 %v862_v35, %v858_v34  ;;  %v3212_v40 = vpack.c.bf16 %v906_v36, %v905_v38  ;;  %v901_v26 = vpop.f32.mrf.mxu1 }
 0x144   : > { %v902_v27 = vadd.f32 %v901_v26, %v689_v16 }
 0x145   : > { %1056 = vrot.lane.b32.xlu0 %v3206_v37, %s2954_s18  ;;  %v940_v39 = vsel %vm935_vm1, %v3206_v37, 0  ;;  %v2462_v28 = vpop.f32.mrf.mxu1 }
 0x146   : > { %2464 = vmatpush3.bf16.xpose.msra.mxu0 %v940_v39  ;;  %v3256_v30 = vpack.c.bf16 %v902_v27, %v899_v21 }
 0x147   : > { %2475 = vmatprep.subr.bf16.mxu0 %v2952_v20 }
 0x148   : > { %2470 = vmatpush3.bf16.msra.mxu1 %v3256_v30 }
 0x149   : > { %1053 = vrot.lane.b32.xlu0 %v3212_v40, %s2954_s18  ;;  %2481 = vmatprep.subr.bf16.mxu1 %v2952_v20 }
 0x14d   : > { %2466 = vmatmul.mubr.msk.bf16.vlgmr.msra.gmra.mxu0 %vm935_vm1, %v3212_v40 }
 0x14e   : > { %2477 = vmatprep.mubr.msk.bf16.mxu0 %vm2953_vm0, %v2952_v20 }
 0x1b7   : > { %v1057_v49 = vpop.permute.xlu0 %1056 }
 0x1b8   : > { %v1062_v50 = vsel %vm935_vm1, %v1057_v49, 0 }
 0x1b9   : > { %2476 = vmatpush3.bf16.xpose.msra.mxu0 %v1062_v50 }
 0x1ba   : > { %2487 = vmatprep.subr.bf16.mxu0 %v2952_v20 }
 0x1bb   : > { %v1054_v51 = vpop.permute.xlu0 %1053 }
 0x1c0   : > { %2478 = vmatmul.mubr.msk.bf16.vlgmr.msra.gmra.mxu0 %vm935_vm1, %v1054_v51 }
 0x1c1   : > { %2491 = vmatprep.mubr.msk.bf16.mxu0 %vm2953_vm0, %v2952_v20  ;;  %2488 = vmatpush3.bf16.msra.mxu0 %v2673_v52 }
 0x1c2   : > { %2489 = vmatprep.subr.bf16.mxu0 %v2952_v20 }
 0x20d   : > { %v976_v55 = vpop.f32.mrf.mxu0 }
 0x20e   : > { %v977_v56 = vadd.f32 %v976_v55, %v3242_v54 }
 0x20f   : > { %v2467_v57 = vpop.f32.mrf.mxu0 }
 0x210   : > { %v984_v58 = vsel %vm983_vm3, %v977_v56, -inf }
 0x211   : > { %985 = vmax.xlane.f32.xlu1 %v984_v58  ;;  %v979_v59 = vpop.f32.mrf.mxu0 }
 0x212   : > { %v980_v60 = vadd.f32 %v979_v59, %v3242_v54 }
 0x213   : > { %v2468_v61 = vpop.f32.mrf.mxu0 }
 0x214   : > { %v987_v62 = vsel %vm983_vm3, %v980_v60, -inf  ;;  %v2671_v61 = vld [vmem:[#allocation5 + $0x8] sm:$0xff]  }
 0x215   : > { %988 = vmax.xlane.f32.xlu1 %v987_v62 }
 0x280   : > { %v1098_v63 = vpop.f32.mrf.mxu0 }
 0x281   : > { %v1099_v1 = vadd.f32 %v1098_v63, %v3242_v54  ;;  %v2672_v63 = vld [vmem:[#allocation5] sm:$0xff]  }
 0x282   : > { %v2479_v2 = vpop.f32.mrf.mxu0 }
 0x283   : > { %v1105_v3 = vsel %vm983_vm3, %v1099_v1, -inf }
 0x284   : > { %1106 = vmax.xlane.f32.xlu0 %v1105_v3  ;;  %v1101_v4 = vpop.f32.mrf.mxu0 }
 0x285   : > { %v1102_v5 = vadd.f32 %v1101_v4, %v3242_v54 }
 0x286   : > { %v2480_v6 = vpop.f32.mrf.mxu0 }
 0x287   : > { %v1108_v7 = vsel %vm983_vm3, %v1102_v5, -inf }
 0x288   : > { %1109 = vmax.xlane.f32.xlu1 %v1108_v7 }
 0x29a   : > { %v986_v8 = vpop.xlane.xlu1 %985  ;;  %1291 = vrot.lane.b32.xlu0 %v3206_v37, %s2955_s23 }
 0x29b   : > { %v990_v9 = vsub.f32 %v977_v56, %v986_v8 }
 0x29d   : > { %v992_v10 = vmul.f32 1.442695, %v990_v9 }
 0x29e   : > { %v989_v11 = vpop.xlane.xlu1 %988 }
 0x29f   : > { %2719 = vpow2.f32 %v992_v10  ;;  %v991_v12 = vsub.f32 %v980_v60, %v989_v11 }
 0x2a1   : > { %v994_v13 = vmul.f32 1.442695, %v991_v12 }
 0x2a3   : > { %2721 = vpow2.f32 %v994_v13 }
 0x2ac   : > { %v2720_v29 = vpop.eup %2719 }
 0x2ad   : > { %v996_v31 = vsel %vm983_vm3, %v2720_v29, 0.0 }
 0x2ae   : > { %997 = vadd.xlane.f32.xlu1 %v996_v31 }
 0x2b0   : > { %v2722_v32 = vpop.eup %2721 }
 0x2b1   : > { %v999_v33 = vsel %vm983_vm3, %v2722_v32, 0.0 }
 0x2b2   : > { %1000 = vadd.xlane.f32.xlu1 %v999_v33 }
 0x30d   : > { %v1107_v25 = vpop.xlane.xlu0 %1106 }
 0x30e   : > { %v1111_v34 = vsub.f32 %v1099_v1, %v1107_v25  ;;  %v2674_v1 = vld [vmem:[#allocation5 + $0x10] sm:$0xff]  }
 0x30f   : > { %2490 = vmatpush3.bf16.msra.mxu0 %v2674_v1 }
 0x310   : > { %v1113_v35 = vmul.f32 1.442695, %v1111_v34  ;;  %2503 = vmatprep.subr.bf16.mxu0 %v2952_v20 }
 0x311   : > { %v1110_v36 = vpop.xlane.xlu1 %1109  ;;  %v1292_v9 = vpop.permute.xlu0 %1291 }
 0x312   : > { %2723 = vpow2.f32 %v1113_v35  ;;  %v1112_v38 = vsub.f32 %v1102_v5, %v1110_v36  ;;  %v1297_v13 = vsel %vm935_vm1, %v1292_v9, 0 }
 0x314   : > { %v1115_v39 = vmul.f32 1.442695, %v1112_v38 }
 0x316   : > { %2725 = vpow2.f32 %v1115_v39 }
 0x31f   : > { %v2724_v41 = vpop.eup %2723 }
 0x320   : > { %v1117_v42 = vsel %vm983_vm3, %v2724_v41, 0.0 }
 0x321   : > { %1118 = vadd.xlane.f32.xlu1 %v1117_v42 }
 0x323   : > { %v2726_v43 = vpop.eup %2725 }
 0x324   : > { %v1120_v44 = vsel %vm983_vm3, %v2726_v43, 0.0 }
 0x325   : > { %1121 = vadd.xlane.f32.xlu1 %v1120_v44 }
 0x336   : > { %1129 = vrot.lane.b32.xlu1 %v3256_v30, %s2954_s18  ;;  %s3489_s18 = smov %s3488_s24 }
 0x337   : > { %v998_v45 = vpop.xlane.xlu1 %997 }
 0x338   : > { %2727 = vrcp.f32 %v998_v45 }
 0x33a   : > { %1289 = vrot.lane.b32.xlu1 %v3212_v40, %s2955_s23 }
 0x33b   : > { %v1001_v46 = vpop.xlane.xlu1 %1000 }
 0x33c   : > { %2729 = vrcp.f32 %v1001_v46 }
 0x345   : > { %v2728_v47 = vpop.eup %2727 }
 0x346   : > { %v1004_v49 = vmul.f32 %v2728_v47, %v2720_v29 }
 0x349   : > { %v2730_v48 = vpop.eup %2729 }
 0x34a   : > { %v1005_v50 = vmul.f32 %v2730_v48, %v2722_v32 }
 0x34c   : > { %v1006_v51 = vpack.c.bf16 %v1005_v50, %v1004_v49 }
 0x34e   : > { %2472 = vmatmul.mubr.msk.bf16.vlgmr.msra.gmra.mxu1 %vm983_vm3, %v1006_v51 }
 0x34f   : > { %2483 = vmatprep.mubr.msk.bf16.mxu1 %vm2953_vm0, %v2952_v20 }
 0x3aa   : > { %v1119_v53 = vpop.xlane.xlu1 %1118 }
 0x3ab   : > { %2731 = vrcp.f32 %v1119_v53 }
 0x3ae   : > { %v1122_v55 = vpop.xlane.xlu1 %1121 }
 0x3af   : > { %2733 = vrcp.f32 %v1122_v55 }
 0x3b2   : > { %v1130_v56 = vpop.permute.xlu1 %1129 }
 0x3b3   : > { %2482 = vmatpush3.bf16.msra.mxu1 %v1130_v56 }
 0x3b4   : > { %2495 = vmatprep.subr.bf16.mxu1 %v2952_v20 }
 0x3b6   : > { %v1290_v14 = vpop.permute.xlu1 %1289 }
 0x3b8   : > { %v2732_v57 = vpop.eup %2731 }
 0x3b9   : > { %v1125_v59 = vmul.f32 %v2732_v57, %v2724_v41 }
 0x3bc   : > { %v2734_v58 = vpop.eup %2733 }
 0x3bd   : > { %v1126_v60 = vmul.f32 %v2734_v58, %v2726_v43 }
 0x3bf   : > { %v1127_v62 = vpack.c.bf16 %v1126_v60, %v1125_v59 }
 0x3c1   : > { %2484 = vmatmul.mubr.msk.bf16.vlgmr.msra.gmra.mxu1 %vm983_vm3, %v1127_v62 }
 0x3c2   : > { %2496 = vmatpush3.bf16.msra.mxu1 %v2671_v61  ;;  %2499 = vmatprep.mubr.msk.bf16.mxu1 %vm2953_vm0, %v2952_v20  ;;  %v2676_v61 = vld [vmem:[#allocation5 + $0x20] sm:$0xff]  }
 0x3c3   : > { %2497 = vmatprep.subr.bf16.mxu1 %v2952_v20 }
 0x3c6   : > { %2498 = vmatpush3.bf16.msra.mxu1 %v2672_v63 }
 0x3c7   : > { %2509 = vmatprep.subr.bf16.mxu1 %v2952_v20 }
 0x40e   : > { %v1044_v2 = vpop.f32.mrf.mxu1 }
 0x410   : > { %v2473_v3 = vpop.f32.mrf.mxu1 }
 0x412   : > { %v1047_v4 = vpop.f32.mrf.mxu1 }
 0x413   : > { %v1051_v5 = vpack.c.bf16 %v1047_v4, %v1044_v2 }
 0x414   : > { %v2474_v6 = vpop.f32.mrf.mxu1 }
 0x415   : > { %2500 = vmatmul.mubr.msk.bf16.vlgmr.msra.gmra.mxu1 %vm935_vm1, %v1051_v5 }
 0x416   : > { %2511 = vmatprep.mubr.msk.bf16.mxu1 %vm2953_vm0, %v2952_v20 }
 0x481   : > { %v1169_v7 = vpop.f32.mrf.mxu1 }
 0x483   : > { %v2485_v8 = vpop.f32.mrf.mxu1 }
 0x485   : > { %v1172_v10 = vpop.f32.mrf.mxu1 }
 0x486   : > { %v1176_v11 = vpack.c.bf16 %v1172_v10, %v1169_v7 }
 0x487   : > { %v2486_v12 = vpop.f32.mrf.mxu1 }
 0x488   : > { %2492 = vmatmul.mubr.msk.bf16.vlgmr.msra.gmra.mxu0 %vm935_vm1, %v1176_v11 }
 0x489   : > { %2504 = vmatpush3.bf16.xpose.msra.mxu0 %v1297_v13  ;;  %2505 = vmatprep.mubr.msk.bf16.mxu0 %vm2953_vm0, %v2952_v20 }
 0x48a   : > { %2515 = vmatprep.subr.bf16.mxu0 %v2952_v20 }
 0x490   : > { %2506 = vmatmul.mubr.msk.bf16.vlgmr.msra.gmra.mxu0 %vm935_vm1, %v1290_v14 }
 0x491   : > { %2519 = vmatprep.mubr.msk.bf16.mxu0 %vm2953_vm0, %v2952_v20 }
 0x4d5   : > { %v3290_v15 = vpop.f32.mrf.mxu1 }
 0x4d7   : > { %v2501_v16 = vpop.f32.mrf.mxu1 }
 0x4d9   : > { %v3292_v19 = vpop.f32.mrf.mxu1 }
 0x4db   : > { %v2502_v21 = vpop.f32.mrf.mxu1 }
 0x548   : > { %v3294_v26 = vpop.f32.mrf.mxu0 }
 0x54a   : > { %v2493_v27 = vpop.f32.mrf.mxu0 }
 0x54c   : > { %v3296_v28 = vpop.f32.mrf.mxu0 }
 0x54e   : > { %v2494_v29 = vpop.f32.mrf.mxu0 }
 0x550   : > { %v1333_v31 = vpop.f32.mrf.mxu0 }
 0x551   : > { %v1334_v32 = vadd.f32 %v1333_v31, %v3242_v54 }
 0x552   : > { %v2507_v33 = vpop.f32.mrf.mxu0 }
 0x553   : > { %v1340_v25 = vsel %vm983_vm3, %v1334_v32, -inf }
 0x554   : > { %1341 = vmax.xlane.f32.xlu1 %v1340_v25  ;;  %v1336_v34 = vpop.f32.mrf.mxu0 }
 0x555   : > { %v1337_v35 = vadd.f32 %v1336_v34, %v3242_v54 }
 0x556   : > { %v2508_v36 = vpop.f32.mrf.mxu0 }
 0x557   : > { %v1343_v38 = vsel %vm983_vm3, %v1337_v35, -inf  ;;  %v1286_v36 = vadd.f32 %v3292_v19, %v3296_v28  ;;  %v2678_v19 = vld [vmem:[#allocation5 + $0x30] sm:$0xff]  }
 0x558   : > { %1344 = vmax.xlane.f32.xlu0 %v1343_v38 }
 0x56e   : > { %1363 = vrot.lane.b32.xlu0 %v3256_v30, %s2955_s23  ;;  %s636_s23 = scalar_lea.vmem %s3487_s22, %s2381_s21  ;;  %s2383_s21 = sshll.u32 %s3071_s28, 8 }
 0x56f   : > { %s3401_s27 = scalar_lea.hbm %s3488_s24, %s2383_s21  ;;  %s2957_s22 = smov [#allocation10]  }
 0x5dd   : > { %v1342_v39 = vpop.xlane.xlu1 %1341 }
 0x5de   : > { %v1346_v41 = vsub.f32 %v1334_v32, %v1342_v39 }
 0x5e0   : > { %v1348_v42 = vmul.f32 1.442695, %v1346_v41 }
 0x5e1   : > { %v1345_v43 = vpop.xlane.xlu0 %1344 }
 0x5e2   : > { %2735 = vpow2.f32 %v1348_v42  ;;  %v1347_v44 = vsub.f32 %v1337_v35, %v1345_v43 }
 0x5e4   : > { %v1350_v45 = vmul.f32 1.442695, %v1347_v44 }
 0x5e5   : > { %v1364_v46 = vpop.permute.xlu0 %1363 }
 0x5e6   : > { %2737 = vpow2.f32 %v1350_v45  ;;  %2510 = vmatpush3.bf16.msra.mxu1 %v1364_v46 }
 0x5e7   : > { %2523 = vmatprep.subr.bf16.mxu1 %v2952_v20 }
 0x5ef   : > { %v2736_v47 = vpop.eup %2735 }
 0x5f0   : > { %v1352_v48 = vsel %vm983_vm3, %v2736_v47, 0.0 }
 0x5f1   : > { %1353 = vadd.xlane.f32.xlu1 %v1352_v48 }
 0x5f3   : > { %v2738_v49 = vpop.eup %2737 }
 0x5f4   : > { %v1355_v50 = vsel %vm983_vm3, %v2738_v49, 0.0 }
 0x5f5   : > { %1356 = vadd.xlane.f32.xlu1 %v1355_v50 }
 0x606   : > { %1471 = vrot.lane.b32.xlu1 %v3206_v37, %s2956_s29 }
 0x60a   : > { %1469 = vrot.lane.b32.xlu1 %v3212_v40, %s2956_s29  ;;  %v2675_v40 = vld [vmem:[#allocation5 + $0x28] sm:$0xff]  }
 0x60b   : > { %2516 = vmatpush3.bf16.msra.mxu0 %v2675_v40 }
 0x60c   : > { %2517 = vmatprep.subr.bf16.mxu0 %v2952_v20 }
 0x60f   : > { %2518 = vmatpush3.bf16.msra.mxu0 %v2676_v61 }
 0x610   : > { %2529 = vmatprep.subr.bf16.mxu0 %v2952_v20 }
 0x67a   : > { %v1354_v51 = vpop.xlane.xlu1 %1353 }
 0x67b   : > { %2739 = vrcp.f32 %v1354_v51 }
 0x67e   : > { %v1357_v52 = vpop.xlane.xlu1 %1356 }
 0x67f   : > { %2741 = vrcp.f32 %v1357_v52 }
 0x682   : > { %v1472_v58 = vpop.permute.xlu1 %1471 }
 0x683   : > { %v1477_v60 = vsel %vm935_vm1, %v1472_v58, 0 }
 0x686   : > { %v1470_v37 = vpop.permute.xlu1 %1469 }
 0x688   : > { %v2740_v53 = vpop.eup %2739 }
 0x689   : > { %v1360_v56 = vmul.f32 %v2740_v53, %v2736_v47  ;;  %v2336_v53 = vld [vmem:[%s3452_s6] ss:$0 sm:$0xff] }
 0x68c   : > { %v2742_v55 = vpop.eup %2741 }
 0x68d   : > { %v1361_v57 = vmul.f32 %v2742_v55, %v2738_v49 }
 0x68f   : > { %v1362_v59 = vpack.c.bf16 %v1361_v57, %v1360_v56 }
 0x691   : > { %2512 = vmatmul.mubr.msk.bf16.vlgmr.msra.gmra.mxu1 %vm983_vm3, %v1362_v59 }
 0x692   : > { %2524 = vmatpush3.bf16.xpose.msra.mxu1 %v1477_v60  ;;  %2525 = vmatprep.mubr.msk.bf16.mxu1 %vm2953_vm0, %v2952_v20 }
 0x693   : > { %2535 = vmatprep.subr.bf16.mxu1 %v2952_v20 }
 0x699   : > { %2526 = vmatmul.mubr.msk.bf16.vlgmr.msra.gmra.mxu1 %vm935_vm1, %v1470_v37 }
 0x69a   : > { %2539 = vmatprep.mubr.msk.bf16.mxu1 %vm2953_vm0, %v2952_v20 }
 0x751   : > { %v1403_v62 = vpop.f32.mrf.mxu1 }
 0x753   : > { %v2513_v63 = vpop.f32.mrf.mxu1 }
 0x755   : > { %v1406_v1 = vpop.f32.mrf.mxu1 }
 0x756   : > { %v1410_v2 = vpack.c.bf16 %v1406_v1, %v1403_v62 }
 0x757   : > { %v2514_v3 = vpop.f32.mrf.mxu1 }
 0x758   : > { %2520 = vmatmul.mubr.msk.bf16.vlgmr.msra.gmra.mxu0 %vm935_vm1, %v1410_v2 }
 0x759   : > { %v1513_v4 = vpop.f32.mrf.mxu1  ;;  %2531 = vmatprep.mubr.msk.bf16.mxu0 %vm2953_vm0, %v2952_v20 }
 0x75a   : > { %v1514_v5 = vadd.f32 %v1513_v4, %v3242_v54 }
 0x75b   : > { %v2527_v6 = vpop.f32.mrf.mxu1 }
 0x75c   : > { %v1520_v7 = vsel %vm983_vm3, %v1514_v5, -inf }
 0x75d   : > { %1521 = vmax.xlane.f32.xlu0 %v1520_v7  ;;  %v1516_v8 = vpop.f32.mrf.mxu1 }
 0x75e   : > { %v1517_v9 = vadd.f32 %v1516_v8, %v3242_v54 }
 0x75f   : > { %v2528_v10 = vpop.f32.mrf.mxu1 }
 0x760   : > { %v1523_v11 = vsel %vm983_vm3, %v1517_v9, -inf }
 0x761   : > { %1524 = vmax.xlane.f32.xlu1 %v1523_v11 }
 0x772   : > { %1543 = vrot.lane.b32.xlu1 %v3256_v30, %s2956_s29  ;;  %v1283_v30 = vadd.f32 %v3290_v15, %v3294_v26  ;;  %v2677_v15 = vld [vmem:[#allocation5 + $0x38] sm:$0xff]   ;;  %s626_s29 = scalar_lea.vmem [#allocation10], %s2287_s26 }
 0x773   : > { %2536 = vmatpush3.bf16.msra.mxu1 %v2677_v15  ;;  %v2693_v15 = vld [vmem:[#allocation7 + $0x34] ss:$8 sps:$4 sm:$0xff]   ;;  %s2151_s30 = sshll.u32 %s626_s29, 4  ;;  %s3403_s30 = int_to_ptr.vmem [resolvable:$true] %s2151_s30 }
 0x774   : > { %2537 = vmatprep.subr.bf16.mxu1 %v2952_v20  ;;  %s2867_s28 = scalar_lea.vmem %s3403_s30, 256 }
 0x775   : > { %p2868_p9 = scmp.ne.s32.totalorder %s3403_s30, %s2867_s28 }
 0x777   : > { %2538 = vmatpush3.bf16.msra.mxu1 %v2678_v19  ;;  %v1743_v19 = vld [vmem:[%s636_s23] sm:$0xff]  ;;  %p2869_p12 = pnand %p2868_p9, %p3088_p5 }
 0x779   : > { %p2870_p13 = pneg %p2869_p12 }
 0x7e6   : > { %v1522_v12 = vpop.xlane.xlu0 %1521 }
 0x7e7   : > { %v1526_v13 = vsub.f32 %v1514_v5, %v1522_v12  ;;  %v2337_v12 = vld [vmem:[%s3453_s7] ss:$0 sm:$0xff] }
 0x7e9   : > { %v1528_v14 = vmul.f32 1.442695, %v1526_v13 }
 0x7ea   : > { %v1525_v16 = vpop.xlane.xlu1 %1524 }
 0x7eb   : > { %2743 = vpow2.f32 %v1528_v14  ;;  %v1527_v21 = vsub.f32 %v1517_v9, %v1525_v16  ;;  %v2338_v14 = vld [vmem:[%s3454_s8] ss:$0 sm:$0xff] }
 0x7ed   : > { %v1530_v27 = vmul.f32 1.442695, %v1527_v21 }
 0x7ee   : > { %v1544_v29 = vpop.permute.xlu1 %1543 }
 0x7ef   : > { %2745 = vpow2.f32 %v1530_v27  ;;  %2530 = vmatpush3.bf16.msra.mxu0 %v1544_v29 }
 0x7f8   : > { %v2744_v31 = vpop.eup %2743 }
 0x7f9   : > { %v1532_v54 = vsel %vm983_vm3, %v2744_v31, 0.0 }
 0x7fa   : > { %1533 = vadd.xlane.f32.xlu0 %v1532_v54 }
 0x7fc   : > { %v2746_v32 = vpop.eup %2745 }
 0x7fd   : > { %v1535_v33 = vsel %vm983_vm3, %v2746_v32, 0.0 }
 0x7fe   : > { %1536 = vadd.xlane.f32.xlu0 %v1535_v33 }
 0x818   : > { %v1460_v25 = vpop.f32.mrf.mxu0 }
 0x819   : > { %v1467_v34 = vadd.f32 %v1460_v25, %v1283_v30  ;;  %v1744_v30 = vld [vmem:[%s636_s23 + $0x8] sm:$0xff]  ;;  %s2871_s23 = sshll.u32 %s2957_s22, 4  ;;  %s2872_s23 = int_to_ptr.vmem [resolvable:$false] %s2871_s23 }
 0x81a   : > { %v2521_v35 = vpop.f32.mrf.mxu0  ;;  %s2873_s26 = scalar_lea.vmem %s2872_s23, 512  ;;  %p2874_p4 = scmp.lt.s32.totalorder %s3403_s30, %s2872_s23 }
 0x81b   : > { %p2875_p7 = scmp.lt.s32.totalorder %s2873_s26, %s2867_s28 }
 0x81c   : > { %v1463_v38 = vpop.f32.mrf.mxu0 }
 0x81d   : > { %v1468_v39 = vadd.f32 %v1463_v38, %v1286_v36  ;;  %p2876_p8 = por %p2875_p7, %p2874_p4 }
 0x81e   : > { %v2522_v41 = vpop.f32.mrf.mxu0 }
 0x81f   : > { %v2681_v41 = vld [vmem:[#allocation7 + $0x74] ss:$8 sps:$4 sm:$0xff]   ;;  %p2877_p11 = pnand %p2876_p8, %p2870_p13 }
 0x820   : > { %1866 = vmatprep.subr.bf16.mxu0 %v2681_v41 }
 0x883   : > { %v1534_v42 = vpop.xlane.xlu0 %1533 }
 0x884   : > { %2747 = vrcp.f32 %v1534_v42  ;;  %v2679_v42 = vld [vmem:[#allocation7 + $0x70] ss:$8 sps:$4 sm:$0xff]  }
 0x887   : > { %v1537_v43 = vpop.xlane.xlu0 %1536 }
 0x888   : > { %2749 = vrcp.f32 %v1537_v43  ;;  %v2684_v43 = vld [vmem:[#allocation7 + $0x64] ss:$8 sps:$4 sm:$0xff]  }
 0x891   : > { %v2748_v44 = vpop.eup %2747 }
 0x892   : > { %v1540_v46 = vmul.f32 %v2748_v44, %v2744_v31  ;;  %v2682_v44 = vld [vmem:[#allocation7 + $0x60] ss:$8 sps:$4 sm:$0xff]  }
 0x895   : > { %v2750_v45 = vpop.eup %2749 }
 0x896   : > { %v1541_v47 = vmul.f32 %v2750_v45, %v2746_v32  ;;  %v2687_v45 = vld [vmem:[#allocation7 + $0x54] ss:$8 sps:$4 sm:$0xff]  }
 0x898   : > { %v1542_v48 = vpack.c.bf16 %v1541_v47, %v1540_v46  ;;  %v2685_v46 = vld [vmem:[#allocation7 + $0x50] ss:$8 sps:$4 sm:$0xff]   ;;  %v2690_v47 = vld [vmem:[#allocation7 + $0x44] ss:$8 sps:$4 sm:$0xff]  }
 0x89a   : > { %2532 = vmatmul.mubr.msk.bf16.vlgmr.msra.gmra.mxu0 %vm983_vm3, %v1542_v48  ;;  %v2688_v48 = vld [vmem:[#allocation7 + $0x40] ss:$8 sps:$4 sm:$0xff]  }
 0x89b   : > { %1898 = vmatprep.mubr.bf16.mxu0 %v2951_v0  ;;  %1867 = vmatpush1.bf16.msra.mxu0 %v2679_v42 }
 0x89c   : > { %1868 = vmatprep.subr.bf16.mxu0 %v2684_v43 }
 0x89f   : > { %1869 = vmatpush1.bf16.msra.mxu0 %v2682_v44 }
 0x8a0   : > { %1870 = vmatprep.subr.bf16.mxu0 %v2687_v45 }
 0x8a3   : > { %1871 = vmatpush1.bf16.msra.mxu0 %v2685_v46 }
 0x8a4   : > { %1872 = vmatprep.subr.bf16.mxu0 %v2690_v47 }
 0x8a7   : > { %1873 = vmatpush1.bf16.msra.mxu0 %v2688_v48 }
 0x8a8   : > { %1874 = vmatprep.subr.bf16.mxu0 %v2693_v15 }
 0x95a   : > { %v1583_v26 = vpop.f32.mrf.mxu0 }
 0x95c   : > { %v2533_v28 = vpop.f32.mrf.mxu0 }
 0x95d   : > { %v2696_v28 = vld [vmem:[#allocation7 + $0x24] ss:$8 sps:$4 sm:$0xff]  }
 0x95e   : > { %v1586_v49 = vpop.f32.mrf.mxu0 }
 0x95f   : > { %v1590_v50 = vpack.c.bf16 %v1586_v49, %v1583_v26  ;;  %v2691_v26 = vld [vmem:[#allocation7 + $0x30] ss:$8 sps:$4 sm:$0xff]   ;;  %v2694_v49 = vld [vmem:[#allocation7 + $0x20] ss:$8 sps:$4 sm:$0xff]  }
 0x960   : > { %v2534_v51 = vpop.f32.mrf.mxu0  ;;  %1875 = vmatpush1.bf16.msra.mxu0 %v2691_v26 }
 0x961   : > { %2540 = vmatmul.mubr.msk.bf16.vlgmr.msra.gmra.mxu1 %vm935_vm1, %v1590_v50  ;;  %1876 = vmatprep.subr.bf16.mxu0 %v2696_v28  ;;  %v2699_v50 = vld [vmem:[#allocation7 + $0x14] ss:$8 sps:$4 sm:$0xff]   ;;  %v2697_v51 = vld [vmem:[#allocation7 + $0x10] ss:$8 sps:$4 sm:$0xff]  }
 0x964   : > { %1877 = vmatpush1.bf16.msra.mxu0 %v2694_v49 }
 0x965   : > { %1878 = vmatprep.subr.bf16.mxu0 %v2699_v50 }
 0x968   : > { %1879 = vmatpush1.bf16.msra.mxu0 %v2697_v51 }
 0xa21   : > { %v1640_v52 = vpop.f32.mrf.mxu1 }
 0xa22   : > { %v1647_v55 = vadd.f32 %v1640_v52, %v1467_v34  ;;  %v2702_v52 = vld [vmem:[#allocation7 + $0x4] ss:$8 sps:$4 sm:$0xff]  }
 0xa23   : > { %v2541_v0 = vpop.f32.mrf.mxu1  ;;  %1880 = vmatprep.subr.bf16.mxu0 %v2702_v52 }
 0xa24   : > { %v1656_v56 = vadd.f32 %v2336_v53, %v1647_v55  ;;  %v2703_v55 = vld [vmem:[#allocation8 + $0x78] sm:$0xff]  }
 0xa25   : > { %v1643_v57 = vpop.f32.mrf.mxu1  ;;  %v2704_v0 = vld [vmem:[#allocation8 + $0x38] sm:$0xff]   ;;  %2421 = vmatprep.subr.bf16.mxu1 %v2703_v55 }
 0xa26   : > { %v1648_v58 = vadd.f32 %v1643_v57, %v1468_v39  ;;  %v1658_v20 = vadd.f32 %v1656_v56, %v3178_v17  ;;  %v2705_v56 = vld [vmem:[#allocation8 + $0x70] sm:$0xff]   ;;  %2422 = vmatpush3.bf16.msra.mxu1 %v2704_v0 }
 0xa27   : > { %v2542_v59 = vpop.f32.mrf.mxu1  ;;  %v2706_v57 = vld [vmem:[#allocation8 + $0x30] sm:$0xff]   ;;  %2423 = vmatprep.subr.bf16.mxu1 %v2705_v56 }
 0xa28   : > { %v1657_v60 = vadd.f32 %v2336_v53, %v1648_v58  ;;  %1662 = vadd.xlane.f32.xlu0 %v1658_v20  ;;  %v2700_v53 = vld [vmem:[#allocation7] ss:$8 sps:$4 sm:$0xff]  }
 0xa29   : > { %1881 = vmatpush1.bf16.msra.mxu0 %v2700_v53  ;;  %v2707_v58 = vld [vmem:[#allocation8 + $0x68] sm:$0xff]   ;;  %v2709_v59 = vld [vmem:[#allocation8 + $0x60] sm:$0xff]  }
 0xa2a   : > { %v1659_v37 = vadd.f32 %v1657_v60, %v3180_v18  ;;  %2424 = vmatpush3.bf16.msra.mxu1 %v2706_v57  ;;  %v2710_v60 = vld [vmem:[#allocation8 + $0x20] sm:$0xff]  }
 0xa2b   : > { %2425 = vmatprep.subr.bf16.mxu1 %v2707_v58 }
 0xa2c   : > { %1664 = vadd.xlane.f32.xlu0 %v1659_v37 }
 0xab1   : > { %v1663_v40 = vpop.xlane.xlu0 %1662 }
 0xab2   : > { %v1667_v61 = vmul.f32 0.0078125, %v1663_v40  ;;  %v2712_v40 = vld [vmem:[#allocation8 + $0x18] sm:$0xff]  }
 0xab4   : > { %v1669_v62 = vsub.f32 %v1658_v20, %v1667_v61  ;;  %v2708_v20 = vld [vmem:[#allocation8 + $0x28] sm:$0xff]  }
 0xab5   : > { %v1665_v63 = vpop.xlane.xlu0 %1664  ;;  %2426 = vmatpush3.bf16.msra.mxu1 %v2708_v20 }
 0xab6   : > { %v1668_v1 = vmul.f32 0.0078125, %v1665_v63  ;;  %v1671_v2 = vmul.f32 %v1669_v62, %v1669_v62  ;;  %2427 = vmatprep.subr.bf16.mxu1 %v2709_v59 }
 0xab8   : > { %v1670_v3 = vsub.f32 %v1659_v37, %v1668_v1  ;;  %1673 = vadd.xlane.f32.xlu0 %v1671_v2  ;;  %v2711_v37 = vld [vmem:[#allocation8 + $0x58] sm:$0xff]  }
 0xab9   : > { %2428 = vmatpush3.bf16.msra.mxu1 %v2710_v60 }
 0xaba   : > { %v1672_v4 = vmul.f32 %v1670_v3, %v1670_v3  ;;  %2429 = vmatprep.subr.bf16.mxu1 %v2711_v37 }
 0xabc   : > { %1675 = vadd.xlane.f32.xlu0 %v1672_v4 }
 0xabd   : > { %2430 = vmatpush3.bf16.msra.mxu1 %v2712_v40 }
 0xb41   : > { %v1674_v5 = vpop.xlane.xlu0 %1673 }
 0xb42   : > { %v1677_v6 = vmul.f32 0.0078125, %v1674_v5  ;;  %v2339_v5 = vld [vmem:[%s3455_s9] ss:$0 sm:$0xff] }
 0xb44   : > { %v1679_v7 = vadd.f32 1e-05, %v1677_v6 }
 0xb45   : > { %v1676_v8 = vpop.xlane.xlu0 %1675 }
 0xb46   : > { %2751 = vrsqrt.f32 %v1679_v7  ;;  %v1678_v9 = vmul.f32 0.0078125, %v1676_v8 }
 0xb48   : > { %v1680_v10 = vadd.f32 1e-05, %v1678_v9  ;;  %v2340_v9 = vld [vmem:[%s3456_s10] ss:$0 sm:$0xff] }
 0xb4a   : > { %2753 = vrsqrt.f32 %v1680_v10 }
 0xb53   : > { %v2752_v11 = vpop.eup %2751 }
 0xb54   : > { %v1683_v13 = vmul.f32 %v2752_v11, %v1669_v62 }
 0xb56   : > { %v1691_v16 = vmul.f32 %v2337_v12, %v1683_v13 }
 0xb57   : > { %v2754_v21 = vpop.eup %2753 }
 0xb58   : > { %v1699_v27 = vadd.f32 %v2338_v14, %v1691_v16  ;;  %v1684_v29 = vmul.f32 %v2754_v21, %v1670_v3 }
 0xb5a   : > { %v1701_v31 = vadd.f32 %v1699_v27, %v3178_v17  ;;  %v1692_v54 = vmul.f32 %v2337_v12, %v1684_v29 }
 0xb5c   : > { %1705 = vadd.xlane.f32.xlu1 %v1701_v31  ;;  %v1700_v32 = vadd.f32 %v2338_v14, %v1692_v54  ;;  %v2714_v54 = vld [vmem:[#allocation8 + $0x10] sm:$0xff]  }
 0xb5e   : > { %v1702_v33 = vadd.f32 %v1700_v32, %v3180_v18  ;;  %v2715_v32 = vld [vmem:[#allocation8 + $0x48] sm:$0xff]  }
 0xb60   : > { %1707 = vadd.xlane.f32.xlu0 %v1702_v33 }
 0xb6d   : > { %1752 = vperm.xlu1 %2638, %v1744_v30   ;;  %v2717_v30 = vld [vmem:[#allocation8 + $0x40] sm:$0xff]  }
 0xbe5   : > { %v1706_v25 = vpop.xlane.xlu1 %1705 }
 0xbe6   : > { %v1709_v34 = vmul.f32 0.0078125, %v1706_v25  ;;  %v2718_v25 = vld [vmem:[#allocation8] sm:$0xff]  }
 0xbe8   : > { %v3358_v35 = vsub.f32 %v1701_v31, %v1709_v34  ;;  %v2713_v31 = vld [vmem:[#allocation8 + $0x50] sm:$0xff]   ;;  %v1774_v34 = vld [vmem:[%s3458_s12] sm:$0x3] }
 0xbe9   : > { %v1708_v36 = vpop.xlane.xlu0 %1707  ;;  %v3376_v14 = vpop.permute.xlu1 %1752  ;;  %2431 = vmatprep.subr.bf16.mxu1 %v2713_v31 }
 0xbea   : > { %v1710_v38 = vmul.f32 0.0078125, %v1708_v36  ;;  %v1713_v17 = vmul.f32 %v3358_v35, %v3358_v35  ;;  %2432 = vmatpush3.bf16.msra.mxu1 %v2714_v54  ;;  %v1783_v36 = vrot.slane %v1774_v34, %v684_v24 }
 0xbeb   : > { %2433 = vmatprep.subr.bf16.mxu1 %v2715_v32 }
 0xbec   : > { %v3362_v39 = vsub.f32 %v1702_v33, %v1710_v38  ;;  %1715 = vadd.xlane.f32.xlu0 %v1713_v17  ;;  %v2716_v33 = vld [vmem:[#allocation8 + $0x8] sm:$0xff]   ;;  %v1779_v38 = vrot.slane %v1774_v34, %v3193_v23 }
 0xbee   : > { %v1714_v18 = vmul.f32 %v3362_v39, %v3362_v39  ;;  %2434 = vmatpush3.bf16.msra.mxu1 %v2716_v33 }
 0xbef   : > { %2435 = vmatprep.subr.bf16.mxu1 %v2717_v30 }
 0xbf0   : > { %1717 = vadd.xlane.f32.xlu0 %v1714_v18 }
 0xbf2   : > { %2436 = vmatpush3.bf16.msra.mxu1 %v2718_v25 }
 0xc06   : > { %1747 = vperm.xlu0 %2637, %v1743_v19  }
 0xc75   : > { %v1716_v61 = vpop.xlane.xlu0 %1715 }
 0xc76   : > { %v1719_v62 = vmul.f32 0.0078125, %v1716_v61 }
 0xc78   : > { %v1721_v63 = vadd.f32 1e-05, %v1719_v62 }
 0xc79   : > { %v1718_v1 = vpop.xlane.xlu0 %1717 }
 0xc7a   : > { %2755 = vrsqrt.f32 %v1721_v63  ;;  %v1720_v2 = vmul.f32 0.0078125, %v1718_v1 }
 0xc7c   : > { %v1722_v3 = vadd.f32 1e-05, %v1720_v2 }
 0xc7e   : > { %2757 = vrsqrt.f32 %v1722_v3 }
 0xc81   : > { %v3374_v13 = vpop.permute.xlu0 %1747 }
 0xc87   : > { %v2756_v4 = vpop.eup %2755 }
 0xc88   : > { %v1725_v6 = vmul.f32 %v2756_v4, %v3358_v35  ;;  %v2374_v4 = vld [vmem:[%s3461_s15] ss:$0 sm:$0xff] }
 0xc8a   : > { %v1733_v7 = vmul.f32 %v2339_v5, %v1725_v6  ;;  %v2375_v6 = vld [vmem:[%s3462_s16] ss:$0 sm:$0xff] }
 0xc8b   : > { %v2758_v8 = vpop.eup %2757 }
 0xc8c   : > { %v1726_v10 = vmul.f32 %v2758_v8, %v3362_v39  ;;  %v1741_v11 = vadd.f32 %v2340_v9, %v1733_v7 }
 0xc8e   : > { %v1734_v12 = vmul.f32 %v2339_v5, %v1726_v10  ;;  %v1755_v21 = vmul.f32 %v3374_v13, %v1741_v11 }
 0xc90   : > { %v1742_v16 = vadd.f32 %v2340_v9, %v1734_v12 }
 0xc92   : > { %v1756_v27 = vmul.f32 %v3376_v14, %v1742_v16 }
 0xc94   : > { %v1757_v29 = vpack.c.bf16 %v1756_v27, %v1755_v21 }
 0xc96   : > { %1899 = vmatmul.mubr.bf16.vlgmr.msra.gmra.mxu0 %v1757_v29 }
 0xd56   : > { %v1900_v35 = vpop.f32.mrf.mxu0 }
 0xd57   : > { %v1901_v42 = vadd.f32 %v1900_v35, %v1779_v38 }
 0xd58   : > { %v1902_v17 = vpop.f32.mrf.mxu0 }
 0xd59   : > { %v1903_v18 = vadd.f32 %v1902_v17, %v1783_v36  ;;  %v1909_v48 = vmax.f32 %v1901_v42, 0.0 }
 0xd5a   : > { %v1904_v39 = vpop.f32.mrf.mxu0 }
 0xd5b   : > { %v1905_v41 = vadd.f32 %v1904_v39, %v1779_v38  ;;  %v1910_v46 = vmax.f32 %v1903_v18, 0.0 }
 0xd5c   : > { %v1906_v43 = vpop.f32.mrf.mxu0 }
 0xd5d   : > { %v1907_v44 = vadd.f32 %v1906_v43, %v1783_v36  ;;  %v1911_v45 = vmax.f32 %v1905_v41, 0.0 }
 0xd5f   : > { %v1912_v47 = vmax.f32 %v1907_v44, 0.0  ;;  %v1913_v19 = vpack.c.bf16 %v1911_v45, %v1909_v48 }
 0xd61   : > { %v1914_v15 = vpack.c.bf16 %v1912_v47, %v1910_v46 }
 0xd63   : > { %2082 = vmatprep.mubr.bf16.mxu1 %v1914_v15 }
 0xd64   : > { %2083 = vmatmul.mubr.bf16.vlgmr.msra.gmra.mxu1 %v1913_v19 }
 0xe24   : > { %v2437_v26 = vpop.f32.mrf.mxu1 }
 0xe26   : > { %v2438_v23 = vpop.f32.mrf.mxu1 }
 0xe27   : > { %v2439_v24 = vadd.f32 %v2438_v23, %v2437_v26 }
 0xe28   : > { %v2440_v28 = vpop.f32.mrf.mxu1 }
 0xe29   : > { %v2085_v49 = vadd.f32 %v2439_v24, %v2357_v22 }
 0xe2a   : > { %v2441_v50 = vpop.f32.mrf.mxu1 }
 0xe2b   : > { %v2442_v51 = vadd.f32 %v2441_v50, %v2440_v28  ;;  %v2091_v52 = vadd.f32 %v2085_v49, %v1755_v21 }
 0xe2d   : > { %v2088_v53 = vadd.f32 %v2442_v51, %v2357_v22  ;;  %2095 = vadd.xlane.f32.xlu1 %v2091_v52 }
 0xe2f   : > { %v2092_v55 = vadd.f32 %v2088_v53, %v1756_v27 }
 0xe31   : > { %2097 = vadd.xlane.f32.xlu0 %v2092_v55 }
 0xeb6   : > { %v2096_v0 = vpop.xlane.xlu1 %2095 }
 0xeb7   : > { %v2099_v56 = vmul.f32 0.0078125, %v2096_v0 }
 0xeb9   : > { %v2101_v57 = vsub.f32 %v2091_v52, %v2099_v56 }
 0xeba   : > { %v2098_v58 = vpop.xlane.xlu0 %2097 }
 0xebb   : > { %v2100_v20 = vmul.f32 0.0078125, %v2098_v58  ;;  %v2103_v59 = vmul.f32 %v2101_v57, %v2101_v57 }
 0xebd   : > { %v2102_v60 = vsub.f32 %v2092_v55, %v2100_v20  ;;  %2105 = vadd.xlane.f32.xlu0 %v2103_v59 }
 0xebf   : > { %v2104_v37 = vmul.f32 %v2102_v60, %v2102_v60 }
 0xec1   : > { %2107 = vadd.xlane.f32.xlu1 %v2104_v37 }
 0xf46   : > { %v2106_v40 = vpop.xlane.xlu0 %2105 }
 0xf47   : > { %v2109_v61 = vmul.f32 0.0078125, %v2106_v40 }
 0xf49   : > { %v2111_v62 = vadd.f32 1e-05, %v2109_v61 }
 0xf4a   : > { %v2108_v63 = vpop.xlane.xlu1 %2107 }
 0xf4b   : > { %2759 = vrsqrt.f32 %v2111_v62  ;;  %v2110_v1 = vmul.f32 0.0078125, %v2108_v63 }
 0xf4d   : > { %v2112_v2 = vadd.f32 1e-05, %v2110_v1 }
 0xf4f   : > { %2761 = vrsqrt.f32 %v2112_v2 }
 0xf58   : > { %v2760_v3 = vpop.eup %2759 }
 0xf59   : > { %v2115_v5 = vmul.f32 %v2760_v3, %v2101_v57 }
 0xf5b   : > { %v2123_v7 = vmul.f32 %v2374_v4, %v2115_v5 }
 0xf5c   : > { %v2762_v8 = vpop.eup %2761 }
 0xf5d   : > { %v2131_v9 = vadd.f32 %v2375_v6, %v2123_v7  ;;  %v2116_v10 = vmul.f32 %v2762_v8, %v2102_v60 }
 0xf5f   : > { %v2124_v11 = vmul.f32 %v2374_v4, %v2116_v10  ;;  %v2133_v12 = vmul.f32 %v2131_v9, %v3374_v13 }
 0xf61   : > { %v2132_v16 = vadd.f32 %v2375_v6, %v2124_v11  ;;  %2135 = vst [vmem:[%s626_s29] sm:$0xff] %v2133_v12 }
 0xf63   : > { %v2134_v21 = vmul.f32 %v2132_v16, %v3376_v14 }
 0xf65   : > { %2136 = vst [vmem:[%s626_s29 + $0x8] sm:$0xff] %v2134_v21 }
 0xf66   : > { %2880 = shalt.err (!%p2877_p11)
}
 0xf67   : > { %s2881_s0 = scalar_lea.hbm %s3401_s27, 256  ;;  %s2885_s20 = scalar_lea.hbm %s3489_s18, 512 }
 0xf68   : > { %p2882_p0 = scmp.ne.s32.totalorder %s3401_s27, %s2881_s0  ;;  %p2886_p3 = scmp.lt.s32.totalorder %s3401_s27, %s3489_s18 }
 0xf69   : > { %p2887_p10 = scmp.lt.s32.totalorder %s2885_s20, %s2881_s0 }
 0xf6a   : > { %p2883_p1 = pnand %p2882_p0, %p3088_p5 }
 0xf6b   : > { %p2888_p9 = por %p2887_p10, %p2886_p3 }
 0xf6c   : > { %p2884_p2 = pneg %p2883_p1 }
 0xf6e   : > { %p2889_p12 = pnand %p2888_p9, %p2884_p2 }
 0xf70   : > { %2892 = shalt.err (!%p2889_p12)
}
 0xf71   : > { %s2958_s28 = smov 128   ;;  %s2959_s22 = smov 8  }
 0xf72   : > { %2559 = dma.vmem_to_hbm [thread:$0]  (%p3088_p5), %s3403_s30, 256, %s3401_s27, %s3406_s19, %s2958_s28, %s2958_s28, %s2959_s22  }
 0xf73 PF: > { %s3490_s23 = sld [smem:[#allocation17_spill]] }
 0xf74   : > { %s3491_s26 = sld [smem:[#allocation15_spill]] }
 0xf79   : > { %p2586_p13 = scmp.ge.s32.totalorder %s3490_s23, 2 }
 0xf7a   : > { %s2166_s29 = sand.u32 1, %s3491_s26  }
 0xf7b   : > { %p2575_p4 = pnand %p2586_p13, %p3092_p6  ;;  %s2167_s0 = scalar_lea.sflag [#allocation4], %s2166_s29 }
 0xf7d   : > { %p2576_p7 = pneg %p2575_p4 }
 0xf7f   : > { %2922 = dma.done.wait (%p2576_p7), %s2167_s0, 256  }
 0xf80   : > { %2924 = vsyncadd (%p2576_p7), %s2167_s0, 4294967040  ;;  %s3493_s27 = sld [smem:[#allocation18_spill]]  ;;  %s3496_s24 = smov %s2931_s25 }
 0xf81   : > { %s3494_s20 = sld [smem:[#allocation16_spill]] }
 0xf82   : > { %s3495_s26 = sld [smem:[#allocation19_spill]] }
 0xf86   : > { %p30_p8 = scmp.ge.s32.totalorder %s3493_s27, 4  }
 0xf87   : > { %s3497_s25 = smov %s3494_s20 }
 0xf88   :  { %32 = sbr.rel (!%p30_p8) target bundleno = 10 (0xa), region = 146 }
 0xf8d   :  { %2172 = vsyncpa [#allocation3], 1 }
 0xf8e   :  { %2174 = vsyncpa [#allocation3 + $0x1], 1 }
 0xf8f   :  { %2175 = vsyncpa [#allocation6], 1 }
 0xf90   :  { %2176 = vsyncpa [#allocation9], 1 }
 0xf91   :  { %2177 = vsyncpa [#allocation4], 1 }
 0xf92   :  { %2179 = vsyncpa [#allocation4 + $0x1], 1 }

</bundles_post_ra>
